<compile_context>
chip_gen: v5e
topology: v5e:2x2
jax: 0.10.0
libtpu: 0.0.40
codegen_flags: <defaults>
</compile_context>

<pallas_src>
from functools import partial

import jax
import jax.numpy as jnp
from jax import lax
from jax.experimental import pallas as pl
from jax.experimental.pallas import tpu as pltpu


def _lsa_kernel(enc_ref, q_ref, loc_ref,
                pw_ref, lw_ref, lb_ref, ww_ref, wb_ref, vw_ref,
                scores_ref, newstate_ref):
    B, T, D = enc_ref.shape
    twoK, F = pw_ref.shape
    K = twoK // 2
    pad = (K - 1) // 2

    # processed_query = query @ W^T + b_W                          -> (B, D)
    pq = jnp.dot(q_ref[...], ww_ref[...],
                 preferred_element_type=jnp.float32) + wb_ref[...]

    # Location conv (Conv1d(2 -> F, kernel K, padding (K-1)//2, no bias))
    # as one im2col MXU matmul:
    #   patches[b, t, 2k + c] = locpad[b, t + k, c]
    #   conv = patches @ Wp,  Wp[2k + c, f] = conv_w[f, c, k]  (packed host-side)
    loc = loc_ref[...]                                             # (B, T+K-1, 2)
    patches = jnp.concatenate([loc[:, k:k + T, :] for k in range(K)],
                              axis=-1)                             # (B, T, 2K)
    conv = jnp.dot(patches.reshape(B * T, twoK), pw_ref[...],
                   preferred_element_type=jnp.float32)             # (B*T, F)

    # processed_loc = conv @ L^T + b_L                             -> (B*T, D)
    ploc = jnp.dot(conv, lw_ref[...],
                   preferred_element_type=jnp.float32) + lb_ref[...]

    # u = v( tanh(processed_query + encoder_seq_proj + processed_loc) )
    h = jnp.tanh(pq[:, None, :] + enc_ref[...] + ploc.reshape(B, T, D))
    u = jnp.sum(h * vw_ref[...], axis=-1, keepdims=True)           # (B, T, 1)

    sig = 1.0 / (1.0 + jnp.exp(-u))
    total = jnp.sum(sig, axis=1, keepdims=True)                    # (B, 1, 1)
    # exact reciprocal: keeps sum(scores) == 1 (approx=True would drift ~1e-3)
    scores = sig * pl.reciprocal(total, approx=False)              # (B, T, 1)

    # lane-dense scores output (T on lanes)
    scores_ref[...] = scores[:, :, 0]                              # (B, T)

    # In-place state update (aliased with the input state buffer):
    # interior ch0 = cumulative + scores, ch1 = scores; padding stays zero.
    cum_new = loc[:, pad:pad + T, 0:1] + scores                    # (B, T, 1)
    interior = jnp.concatenate([cum_new, scores], axis=-1)         # (B, T, 2)
    zpad = jnp.zeros((B, pad, 2), jnp.float32)
    newstate_ref[...] = jnp.concatenate([zpad, interior, zpad], axis=1)


def prepare_lsa_params(params):
    """One-time parameter re-layout (hoisted out of the decode loop)."""
    conv_w, lw, lb, ww, wb, vw = (params["conv_w"], params["L_w"], params["L_b"],
                                  params["W_w"], params["W_b"], params["v_w"])
    F, C, K = conv_w.shape                    # (filters, 2, kernel)
    # im2col-packed conv weight: Wp[k*2 + c, f] = conv_w[f, c, k]
    patch_w = jnp.transpose(conv_w, (2, 1, 0)).reshape(C * K, F)   # (2K, F)
    return {
        "patch_w": patch_w,
        "lw_t": lw.T,                         # (F, D)
        "lb2": lb[None, :],                   # (1, D)
        "ww_t": ww.T,                         # (D, D)
        "wb2": wb[None, :],                   # (1, D)
        "vw2": vw,                            # (1, D)
    }


def init_lsa_state(B, T, K):
    """Zero-initialized padded location state (matches init_attention at t=0)."""
    return jnp.zeros((B, T + K - 1, 2), jnp.float32)


@partial(jax.jit, donate_argnums=(2,))
def lsa_forward(enc, query, state, packed):
    """One LSA step.

    enc    : (B, T, D)   encoder_seq_proj
    query  : (B, D)      attention RNN hidden state
    state  : (B, T+K-1, 2) padded location state (ch0=cumulative, ch1=attention)
    Returns (scores (B, 1, T), new_state (B, T+K-1, 2)).
    """
    B, T, D = enc.shape
    twoK, F = packed["patch_w"].shape
    K = twoK // 2
    Tp = T + K - 1

    scores, new_state = pl.pallas_call(
        _lsa_kernel,
        grid=(1,),
        in_specs=[
            pl.BlockSpec((B, T, D), lambda i: (0, 0, 0)),     # encoder_seq_proj
            pl.BlockSpec((B, D), lambda i: (0, 0)),           # query
            pl.BlockSpec((B, Tp, 2), lambda i: (0, 0, 0)),    # padded location state
            pl.BlockSpec((twoK, F), lambda i: (0, 0)),        # packed conv weight
            pl.BlockSpec((F, D), lambda i: (0, 0)),           # L weight (F, D)
            pl.BlockSpec((1, D), lambda i: (0, 0)),           # L bias
            pl.BlockSpec((D, D), lambda i: (0, 0)),           # W weight (D, D)
            pl.BlockSpec((1, D), lambda i: (0, 0)),           # W bias
            pl.BlockSpec((1, D), lambda i: (0, 0)),           # v weight
        ],
        out_specs=(
            pl.BlockSpec((B, T), lambda i: (0, 0)),           # scores (lane-dense)
            pl.BlockSpec((B, Tp, 2), lambda i: (0, 0, 0)),    # new state
        ),
        out_shape=(
            jax.ShapeDtypeStruct((B, T), jnp.float32),
            jax.ShapeDtypeStruct((B, Tp, 2), jnp.float32),
        ),
        input_output_aliases={2: 1},                          # state updated in place
        compiler_params=pltpu.CompilerParams(
            dimension_semantics=("arbitrary",)),
    )(enc, query, state,
      packed["patch_w"], packed["lw_t"], packed["lb2"],
      packed["ww_t"], packed["wb2"], packed["vw2"])

    return scores[:, None, :], new_state


def lsa_reference(enc, query, cumulative, attention, params):
    """Plain-JAX reference replicating the PyTorch forward exactly."""
    conv_w, lw, lb, ww, wb, vw = (params["conv_w"], params["L_w"], params["L_b"],
                                  params["W_w"], params["W_b"], params["v_w"])
    pad = (conv_w.shape[-1] - 1) // 2
    pq = query @ ww.T + wb                                      # (B, D)
    loc = jnp.stack([cumulative, attention], axis=1)            # (B, 2, T)
    conv = lax.conv_general_dilated(
        loc, conv_w, window_strides=(1,), padding=[(pad, pad)],
        dimension_numbers=("NCW", "OIW", "NCW"))                # (B, F, T)
    ploc = jnp.einsum("bft,df->btd", conv, lw) + lb             # (B, T, D)
    h = jnp.tanh(pq[:, None, :] + enc + ploc)
    u = jnp.einsum("btd,d->bt", h, vw[0])
    sig = jax.nn.sigmoid(u)
    scores = sig / jnp.sum(sig, axis=1, keepdims=True)
    return scores[:, None, :], cumulative + scores, scores


if __name__ == "__main__":
    B, T, D, F, K = 2, 16, 32, 32, 31   # batch, enc length, attn_dim, filters, kernel
    pad = (K - 1) // 2

    key = jax.random.PRNGKey(0)
    ks = jax.random.split(key, 8)
    params = {
        "conv_w": 0.1 * jax.random.normal(ks[0], (F, 2, K), jnp.float32),
        "L_w":    0.1 * jax.random.normal(ks[1], (D, F), jnp.float32),
        "L_b":    0.1 * jax.random.normal(ks[2], (D,), jnp.float32),
        "W_w":    0.1 * jax.random.normal(ks[3], (D, D), jnp.float32),
        "W_b":    0.1 * jax.random.normal(ks[4], (D,), jnp.float32),
        "v_w":    0.1 * jax.random.normal(ks[5], (1, D), jnp.float32),
    }
    enc = jax.random.normal(ks[6], (B, T, D), jnp.float32)
    query = jax.random.normal(ks[7], (B, D), jnp.float32)

    # one-time parameter packing (hoisted out of the decode loop)
    packed = prepare_lsa_params(params)

    # t = 0: state zero-initialised (matches init_attention)
    state0 = init_lsa_state(B, T, K)
    s0, state1 = lsa_forward(enc, query, state0, packed)        # step t=0
    s1, state2 = lsa_forward(enc, query, state1, packed)        # step t=1 (non-zero loc)
    jax.block_until_ready((s0, s1, state2))

    cum2 = state2[:, pad:pad + T, 0]
    att2 = state2[:, pad:pad + T, 1]

    # verify against plain-JAX reference
    r0, rcum1, ratt1 = lsa_reference(enc, query,
                                     jnp.zeros((B, T), jnp.float32),
                                     jnp.zeros((B, T), jnp.float32), params)
    r1, rcum2, ratt2 = lsa_reference(enc, query, rcum1, ratt1, params)

    assert s0.shape == (B, 1, T) and s1.shape == (B, 1, T)
    assert jnp.allclose(s0, r0, atol=1e-5), "step-0 scores mismatch"
    assert jnp.allclose(s1, r1, atol=1e-5), "step-1 scores mismatch"
    assert jnp.allclose(cum2, rcum2, atol=1e-5), "cumulative mismatch"
    assert jnp.allclose(att2, ratt2, atol=1e-5), "attention-state mismatch"

    print("KERNEL_OK")
</pallas_src>

<mosaic_0001>
module attributes {stable_mosaic.version = 11 : i64} {
  func.func @_lsa_kernel(%arg0: i32, %arg1: memref<2x16x32xf32, #tpu.memory_space<vmem>>, %arg2: memref<2x32xf32, #tpu.memory_space<vmem>>, %arg3: memref<2x46x2xf32, #tpu.memory_space<vmem>>, %arg4: memref<62x32xf32, #tpu.memory_space<vmem>>, %arg5: memref<32x32xf32, #tpu.memory_space<vmem>>, %arg6: memref<1x32xf32, #tpu.memory_space<vmem>>, %arg7: memref<32x32xf32, #tpu.memory_space<vmem>>, %arg8: memref<1x32xf32, #tpu.memory_space<vmem>>, %arg9: memref<1x32xf32, #tpu.memory_space<vmem>>, %arg10: memref<2x16xf32, #tpu.memory_space<vmem>>, %arg11: memref<2x46x2xf32, #tpu.memory_space<vmem>>) attributes {dimension_semantics = [#tpu.dimension_semantics<arbitrary>], iteration_bounds = array<i64: 1>, scalar_prefetch = 0 : i64, scratch_operands = 0 : i64, tpu.core_type = #tpu.core_type<tc>, window_params = [{pipeline_mode = #tpu.pipeline_mode<synchronous>, transform_indices = @transform_0, window_bounds = array<i64: 2, 16, 32>}, {pipeline_mode = #tpu.pipeline_mode<synchronous>, transform_indices = @transform_1, window_bounds = array<i64: 2, 32>}, {pipeline_mode = #tpu.pipeline_mode<synchronous>, transform_indices = @transform_2, window_bounds = array<i64: 2, 46, 2>}, {pipeline_mode = #tpu.pipeline_mode<synchronous>, transform_indices = @transform_3, window_bounds = array<i64: 62, 32>}, {pipeline_mode = #tpu.pipeline_mode<synchronous>, transform_indices = @transform_4, window_bounds = array<i64: 32, 32>}, {pipeline_mode = #tpu.pipeline_mode<synchronous>, transform_indices = @transform_5, window_bounds = array<i64: 1, 32>}, {pipeline_mode = #tpu.pipeline_mode<synchronous>, transform_indices = @transform_6, window_bounds = array<i64: 32, 32>}, {pipeline_mode = #tpu.pipeline_mode<synchronous>, transform_indices = @transform_7, window_bounds = array<i64: 1, 32>}, {pipeline_mode = #tpu.pipeline_mode<synchronous>, transform_indices = @transform_8, window_bounds = array<i64: 1, 32>}, {pipeline_mode = #tpu.pipeline_mode<synchronous>, transform_indices = @transform_9, window_bounds = array<i64: 2, 16>}, {pipeline_mode = #tpu.pipeline_mode<synchronous>, transform_indices = @transform_10, window_bounds = array<i64: 2, 46, 2>}]} {
    %c0 = arith.constant 0 : index
    %c0_0 = arith.constant 0 : index
    %0 = vector.load %arg2[%c0, %c0_0] : memref<2x32xf32, #tpu.memory_space<vmem>>, vector<2x32xf32>
    %c0_1 = arith.constant 0 : index
    %c0_2 = arith.constant 0 : index
    %1 = vector.load %arg7[%c0_1, %c0_2] : memref<32x32xf32, #tpu.memory_space<vmem>>, vector<32x32xf32>
    %cst = arith.constant dense<0.000000e+00> : vector<2x32xf32>
    %2 = tpu.matmul %0, %1, %cst {dimension_numbers = #tpu.dot_dimension_numbers<[1], [0], [0], [1], [0, 0, 1, 1], [], []>} : vector<2x32xf32>, vector<32x32xf32>, vector<2x32xf32> -> vector<2x32xf32>
    %c0_3 = arith.constant 0 : index
    %c0_4 = arith.constant 0 : index
    %3 = vector.load %arg8[%c0_3, %c0_4] : memref<1x32xf32, #tpu.memory_space<vmem>>, vector<1x32xf32>
    %4 = vector.broadcast %3 : vector<1x32xf32> to vector<2x32xf32>
    %5 = arith.addf %2, %4 : vector<2x32xf32>
    %c0_5 = arith.constant 0 : index
    %c0_6 = arith.constant 0 : index
    %c0_7 = arith.constant 0 : index
    %6 = vector.load %arg3[%c0_5, %c0_6, %c0_7] : memref<2x46x2xf32, #tpu.memory_space<vmem>>, vector<2x46x2xf32>
    %7 = vector.extract_strided_slice %6 {offsets = [0, 0, 0], sizes = [2, 16, 2], strides = [1, 1, 1]} : vector<2x46x2xf32> to vector<2x16x2xf32>
    %8 = vector.extract_strided_slice %6 {offsets = [0, 1, 0], sizes = [2, 16, 2], strides = [1, 1, 1]} : vector<2x46x2xf32> to vector<2x16x2xf32>
    %9 = vector.extract_strided_slice %6 {offsets = [0, 2, 0], sizes = [2, 16, 2], strides = [1, 1, 1]} : vector<2x46x2xf32> to vector<2x16x2xf32>
    %10 = vector.extract_strided_slice %6 {offsets = [0, 3, 0], sizes = [2, 16, 2], strides = [1, 1, 1]} : vector<2x46x2xf32> to vector<2x16x2xf32>
    %11 = vector.extract_strided_slice %6 {offsets = [0, 4, 0], sizes = [2, 16, 2], strides = [1, 1, 1]} : vector<2x46x2xf32> to vector<2x16x2xf32>
    %12 = vector.extract_strided_slice %6 {offsets = [0, 5, 0], sizes = [2, 16, 2], strides = [1, 1, 1]} : vector<2x46x2xf32> to vector<2x16x2xf32>
    %13 = vector.extract_strided_slice %6 {offsets = [0, 6, 0], sizes = [2, 16, 2], strides = [1, 1, 1]} : vector<2x46x2xf32> to vector<2x16x2xf32>
    %14 = vector.extract_strided_slice %6 {offsets = [0, 7, 0], sizes = [2, 16, 2], strides = [1, 1, 1]} : vector<2x46x2xf32> to vector<2x16x2xf32>
    %15 = vector.extract_strided_slice %6 {offsets = [0, 8, 0], sizes = [2, 16, 2], strides = [1, 1, 1]} : vector<2x46x2xf32> to vector<2x16x2xf32>
    %16 = vector.extract_strided_slice %6 {offsets = [0, 9, 0], sizes = [2, 16, 2], strides = [1, 1, 1]} : vector<2x46x2xf32> to vector<2x16x2xf32>
    %17 = vector.extract_strided_slice %6 {offsets = [0, 10, 0], sizes = [2, 16, 2], strides = [1, 1, 1]} : vector<2x46x2xf32> to vector<2x16x2xf32>
    %18 = vector.extract_strided_slice %6 {offsets = [0, 11, 0], sizes = [2, 16, 2], strides = [1, 1, 1]} : vector<2x46x2xf32> to vector<2x16x2xf32>
    %19 = vector.extract_strided_slice %6 {offsets = [0, 12, 0], sizes = [2, 16, 2], strides = [1, 1, 1]} : vector<2x46x2xf32> to vector<2x16x2xf32>
    %20 = vector.extract_strided_slice %6 {offsets = [0, 13, 0], sizes = [2, 16, 2], strides = [1, 1, 1]} : vector<2x46x2xf32> to vector<2x16x2xf32>
    %21 = vector.extract_strided_slice %6 {offsets = [0, 14, 0], sizes = [2, 16, 2], strides = [1, 1, 1]} : vector<2x46x2xf32> to vector<2x16x2xf32>
    %22 = vector.extract_strided_slice %6 {offsets = [0, 15, 0], sizes = [2, 16, 2], strides = [1, 1, 1]} : vector<2x46x2xf32> to vector<2x16x2xf32>
    %23 = vector.extract_strided_slice %6 {offsets = [0, 16, 0], sizes = [2, 16, 2], strides = [1, 1, 1]} : vector<2x46x2xf32> to vector<2x16x2xf32>
    %24 = vector.extract_strided_slice %6 {offsets = [0, 17, 0], sizes = [2, 16, 2], strides = [1, 1, 1]} : vector<2x46x2xf32> to vector<2x16x2xf32>
    %25 = vector.extract_strided_slice %6 {offsets = [0, 18, 0], sizes = [2, 16, 2], strides = [1, 1, 1]} : vector<2x46x2xf32> to vector<2x16x2xf32>
    %26 = vector.extract_strided_slice %6 {offsets = [0, 19, 0], sizes = [2, 16, 2], strides = [1, 1, 1]} : vector<2x46x2xf32> to vector<2x16x2xf32>
    %27 = vector.extract_strided_slice %6 {offsets = [0, 20, 0], sizes = [2, 16, 2], strides = [1, 1, 1]} : vector<2x46x2xf32> to vector<2x16x2xf32>
    %28 = vector.extract_strided_slice %6 {offsets = [0, 21, 0], sizes = [2, 16, 2], strides = [1, 1, 1]} : vector<2x46x2xf32> to vector<2x16x2xf32>
    %29 = vector.extract_strided_slice %6 {offsets = [0, 22, 0], sizes = [2, 16, 2], strides = [1, 1, 1]} : vector<2x46x2xf32> to vector<2x16x2xf32>
    %30 = vector.extract_strided_slice %6 {offsets = [0, 23, 0], sizes = [2, 16, 2], strides = [1, 1, 1]} : vector<2x46x2xf32> to vector<2x16x2xf32>
    %31 = vector.extract_strided_slice %6 {offsets = [0, 24, 0], sizes = [2, 16, 2], strides = [1, 1, 1]} : vector<2x46x2xf32> to vector<2x16x2xf32>
    %32 = vector.extract_strided_slice %6 {offsets = [0, 25, 0], sizes = [2, 16, 2], strides = [1, 1, 1]} : vector<2x46x2xf32> to vector<2x16x2xf32>
    %33 = vector.extract_strided_slice %6 {offsets = [0, 26, 0], sizes = [2, 16, 2], strides = [1, 1, 1]} : vector<2x46x2xf32> to vector<2x16x2xf32>
    %34 = vector.extract_strided_slice %6 {offsets = [0, 27, 0], sizes = [2, 16, 2], strides = [1, 1, 1]} : vector<2x46x2xf32> to vector<2x16x2xf32>
    %35 = vector.extract_strided_slice %6 {offsets = [0, 28, 0], sizes = [2, 16, 2], strides = [1, 1, 1]} : vector<2x46x2xf32> to vector<2x16x2xf32>
    %36 = vector.extract_strided_slice %6 {offsets = [0, 29, 0], sizes = [2, 16, 2], strides = [1, 1, 1]} : vector<2x46x2xf32> to vector<2x16x2xf32>
    %37 = vector.extract_strided_slice %6 {offsets = [0, 30, 0], sizes = [2, 16, 2], strides = [1, 1, 1]} : vector<2x46x2xf32> to vector<2x16x2xf32>
    %38 = tpu.concatenate %7, %8, %9, %10, %11, %12, %13, %14, %15, %16, %17, %18, %19, %20, %21, %22 in 2 : vector<2x16x2xf32>, vector<2x16x2xf32>, vector<2x16x2xf32>, vector<2x16x2xf32>, vector<2x16x2xf32>, vector<2x16x2xf32>, vector<2x16x2xf32>, vector<2x16x2xf32>, vector<2x16x2xf32>, vector<2x16x2xf32>, vector<2x16x2xf32>, vector<2x16x2xf32>, vector<2x16x2xf32>, vector<2x16x2xf32>, vector<2x16x2xf32>, vector<2x16x2xf32> -> vector<2x16x32xf32>
    %39 = tpu.concatenate %23, %24, %25, %26, %27, %28, %29, %30, %31, %32, %33, %34, %35, %36, %37 in 2 : vector<2x16x2xf32>, vector<2x16x2xf32>, vector<2x16x2xf32>, vector<2x16x2xf32>, vector<2x16x2xf32>, vector<2x16x2xf32>, vector<2x16x2xf32>, vector<2x16x2xf32>, vector<2x16x2xf32>, vector<2x16x2xf32>, vector<2x16x2xf32>, vector<2x16x2xf32>, vector<2x16x2xf32>, vector<2x16x2xf32>, vector<2x16x2xf32> -> vector<2x16x30xf32>
    %40 = tpu.concatenate %38, %39 in 2 : vector<2x16x32xf32>, vector<2x16x30xf32> -> vector<2x16x62xf32>
    %41 = vector.shape_cast %40 : vector<2x16x62xf32> to vector<32x62xf32>
    %c0_8 = arith.constant 0 : index
    %c0_9 = arith.constant 0 : index
    %42 = vector.load %arg4[%c0_8, %c0_9] : memref<62x32xf32, #tpu.memory_space<vmem>>, vector<62x32xf32>
    %cst_10 = arith.constant dense<0.000000e+00> : vector<32x32xf32>
    %43 = tpu.matmul %41, %42, %cst_10 {dimension_numbers = #tpu.dot_dimension_numbers<[1], [0], [0], [1], [0, 0, 1, 1], [], []>} : vector<32x62xf32>, vector<62x32xf32>, vector<32x32xf32> -> vector<32x32xf32>
    %c0_11 = arith.constant 0 : index
    %c0_12 = arith.constant 0 : index
    %44 = vector.load %arg5[%c0_11, %c0_12] : memref<32x32xf32, #tpu.memory_space<vmem>>, vector<32x32xf32>
    %cst_13 = arith.constant dense<0.000000e+00> : vector<32x32xf32>
    %45 = tpu.matmul %43, %44, %cst_13 {dimension_numbers = #tpu.dot_dimension_numbers<[1], [0], [0], [1], [0, 0, 1, 1], [], []>} : vector<32x32xf32>, vector<32x32xf32>, vector<32x32xf32> -> vector<32x32xf32>
    %c0_14 = arith.constant 0 : index
    %c0_15 = arith.constant 0 : index
    %46 = vector.load %arg6[%c0_14, %c0_15] : memref<1x32xf32, #tpu.memory_space<vmem>>, vector<1x32xf32>
    %47 = vector.broadcast %46 : vector<1x32xf32> to vector<32x32xf32>
    %48 = arith.addf %45, %47 : vector<32x32xf32>
    %49 = vector.shape_cast %5 : vector<2x32xf32> to vector<2x1x32xf32>
    %c0_16 = arith.constant 0 : index
    %c0_17 = arith.constant 0 : index
    %c0_18 = arith.constant 0 : index
    %50 = vector.load %arg1[%c0_16, %c0_17, %c0_18] : memref<2x16x32xf32, #tpu.memory_space<vmem>>, vector<2x16x32xf32>
    %51 = vector.broadcast %49 : vector<2x1x32xf32> to vector<2x16x32xf32>
    %52 = arith.addf %51, %50 : vector<2x16x32xf32>
    %53 = vector.shape_cast %48 : vector<32x32xf32> to vector<2x16x32xf32>
    %54 = arith.addf %52, %53 : vector<2x16x32xf32>
    %55 = math.tanh %54 : vector<2x16x32xf32>
    %c0_19 = arith.constant 0 : index
    %c0_20 = arith.constant 0 : index
    %56 = vector.load %arg9[%c0_19, %c0_20] : memref<1x32xf32, #tpu.memory_space<vmem>>, vector<1x32xf32>
    %57 = vector.shape_cast %56 : vector<1x32xf32> to vector<1x1x32xf32>
    %58 = vector.broadcast %57 : vector<1x1x32xf32> to vector<2x16x32xf32>
    %59 = arith.mulf %55, %58 : vector<2x16x32xf32>
    %cst_21 = arith.constant dense<0.000000e+00> : vector<2x16xf32>
    %60 = vector.multi_reduction <add>, %59, %cst_21 [2] : vector<2x16x32xf32> to vector<2x16xf32>
    %61 = vector.shape_cast %60 : vector<2x16xf32> to vector<2x16x1xf32>
    %cst_22 = arith.constant 0.000000e+00 : f32
    %62 = vector.broadcast %cst_22 : f32 to vector<2x16x1xf32>
    %63 = arith.subf %62, %61 : vector<2x16x1xf32>
    %64 = math.exp %63 : vector<2x16x1xf32>
    %cst_23 = arith.constant 1.000000e+00 : f32
    %65 = vector.broadcast %cst_23 : f32 to vector<2x16x1xf32>
    %66 = arith.addf %65, %64 : vector<2x16x1xf32>
    %cst_24 = arith.constant 1.000000e+00 : f32
    %67 = vector.broadcast %cst_24 : f32 to vector<2x16x1xf32>
    %68 = arith.divf %67, %66 : vector<2x16x1xf32>
    %cst_25 = arith.constant dense<0.000000e+00> : vector<2x1xf32>
    %69 = vector.multi_reduction <add>, %68, %cst_25 [1] : vector<2x16x1xf32> to vector<2x1xf32>
    %70 = vector.shape_cast %69 : vector<2x1xf32> to vector<2x1x1xf32>
    %71 = tpu.reciprocal %70 : vector<2x1x1xf32> -> vector<2x1x1xf32>
    %72 = vector.broadcast %71 : vector<2x1x1xf32> to vector<2x16x1xf32>
    %73 = arith.mulf %68, %72 : vector<2x16x1xf32>
    %74 = vector.shape_cast %73 : vector<2x16x1xf32> to vector<2x16xf32>
    %c0_26 = arith.constant 0 : index
    %c0_27 = arith.constant 0 : index
    %75 = vector.load %arg10[%c0_26, %c0_27] : memref<2x16xf32, #tpu.memory_space<vmem>>, vector<2x16xf32>
    tpu.vector_store %arg10[%c0_26, %c0_27], %74 {strides = array<i32>} : memref<2x16xf32, #tpu.memory_space<vmem>>, vector<2x16xf32>,
    %76 = vector.extract_strided_slice %6 {offsets = [0, 15, 0], sizes = [2, 16, 1], strides = [1, 1, 1]} : vector<2x46x2xf32> to vector<2x16x1xf32>
    %77 = arith.addf %76, %73 : vector<2x16x1xf32>
    %78 = tpu.concatenate %77, %73 in 2 : vector<2x16x1xf32>, vector<2x16x1xf32> -> vector<2x16x2xf32>
    %cst_28 = arith.constant 0.000000e+00 : f32
    %79 = vector.broadcast %cst_28 : f32 to vector<2x15x2xf32>
    %80 = tpu.concatenate %79, %78, %79 in 1 : vector<2x15x2xf32>, vector<2x16x2xf32>, vector<2x15x2xf32> -> vector<2x46x2xf32>
    %c0_29 = arith.constant 0 : index
    %c0_30 = arith.constant 0 : index
    %c0_31 = arith.constant 0 : index
    %81 = vector.load %arg11[%c0_29, %c0_30, %c0_31] : memref<2x46x2xf32, #tpu.memory_space<vmem>>, vector<2x46x2xf32>
    tpu.vector_store %arg11[%c0_29, %c0_30, %c0_31], %80 {strides = array<i32>} : memref<2x46x2xf32, #tpu.memory_space<vmem>>, vector<2x46x2xf32>,
    return
  }
  func.func @transform_0(%arg0: i32) -> (i32, i32, i32) {
    %c0_i32 = arith.constant 0 : i32
    %c0_i32_0 = arith.constant 0 : i32
    %c0_i32_1 = arith.constant 0 : i32
    %c0_i32_2 = arith.constant 0 : i32
    return %c0_i32, %c0_i32_0, %c0_i32_1 : i32, i32, i32
  }
  func.func @transform_1(%arg0: i32) -> (i32, i32) {
    %c0_i32 = arith.constant 0 : i32
    %c0_i32_0 = arith.constant 0 : i32
    %c0_i32_1 = arith.constant 0 : i32
    return %c0_i32, %c0_i32_0 : i32, i32
  }
  func.func @transform_2(%arg0: i32) -> (i32, i32, i32) {
    %c0_i32 = arith.constant 0 : i32
    %c0_i32_0 = arith.constant 0 : i32
    %c0_i32_1 = arith.constant 0 : i32
    %c0_i32_2 = arith.constant 0 : i32
    return %c0_i32, %c0_i32_0, %c0_i32_1 : i32, i32, i32
  }
  func.func @transform_3(%arg0: i32) -> (i32, i32) {
    %c0_i32 = arith.constant 0 : i32
    %c0_i32_0 = arith.constant 0 : i32
    %c0_i32_1 = arith.constant 0 : i32
    return %c0_i32, %c0_i32_0 : i32, i32
  }
  func.func @transform_4(%arg0: i32) -> (i32, i32) {
    %c0_i32 = arith.constant 0 : i32
    %c0_i32_0 = arith.constant 0 : i32
    %c0_i32_1 = arith.constant 0 : i32
    return %c0_i32, %c0_i32_0 : i32, i32
  }
  func.func @transform_5(%arg0: i32) -> (i32, i32) {
    %c0_i32 = arith.constant 0 : i32
    %c0_i32_0 = arith.constant 0 : i32
    %c0_i32_1 = arith.constant 0 : i32
    return %c0_i32, %c0_i32_0 : i32, i32
  }
  func.func @transform_6(%arg0: i32) -> (i32, i32) {
    %c0_i32 = arith.constant 0 : i32
    %c0_i32_0 = arith.constant 0 : i32
    %c0_i32_1 = arith.constant 0 : i32
    return %c0_i32, %c0_i32_0 : i32, i32
  }
  func.func @transform_7(%arg0: i32) -> (i32, i32) {
    %c0_i32 = arith.constant 0 : i32
    %c0_i32_0 = arith.constant 0 : i32
    %c0_i32_1 = arith.constant 0 : i32
    return %c0_i32, %c0_i32_0 : i32, i32
  }
  func.func @transform_8(%arg0: i32) -> (i32, i32) {
    %c0_i32 = arith.constant 0 : i32
    %c0_i32_0 = arith.constant 0 : i32
    %c0_i32_1 = arith.constant 0 : i32
    return %c0_i32, %c0_i32_0 : i32, i32
  }
  func.func @transform_9(%arg0: i32) -> (i32, i32) {
    %c0_i32 = arith.constant 0 : i32
    %c0_i32_0 = arith.constant 0 : i32
    %c0_i32_1 = arith.constant 0 : i32
    return %c0_i32, %c0_i32_0 : i32, i32
  }
  func.func @transform_10(%arg0: i32) -> (i32, i32, i32) {
    %c0_i32 = arith.constant 0 : i32
    %c0_i32_0 = arith.constant 0 : i32
    %c0_i32_1 = arith.constant 0 : i32
    %c0_i32_2 = arith.constant 0 : i32
    return %c0_i32, %c0_i32_0, %c0_i32_1 : i32, i32, i32
  }
}

</mosaic_0001>

<bundles_post_ra>
// kernel: lsa_forward.1
= control target key start
LH: loop header
LB: loop body
LE: loop exit
PB: predicated region body
PF: predicated region fallthrough
CT: control target
= control target key end

     0   :  { %vm178_vm0 = vcmask 1042432   ;;  %vm132_vm1 = vcmask 1044480   ;;  %vm2204_vm2 = vcmask 1046528   ;;  %s1198_s17 = smov 10   ;;  %s1199_s18 = smov 6   ;;  %vm201_vm3 = vcmask 1041408   ;;  %s2187_s0 = inlined_call_operand.vmem [shape: f32[2,16,32], index: 0, kind: input, shape index: {}]   ;;  %s2188_s1 = inlined_call_operand.vmem [shape: f32[2,32], index: 1, kind: input, shape index: {}]   ;;  %s2189_s2 = inlined_call_operand.vmem [shape: f32[2,46,2], index: 2, kind: input, shape index: {}, may-alias: {2,10}]   ;;  %s2190_s3 = inlined_call_operand.vmem [shape: f32[62,32], index: 3, kind: input, shape index: {}]   ;;  %s2191_s4 = inlined_call_operand.vmem [shape: f32[32,32], index: 4, kind: input, shape index: {}]   ;;  %s2192_s5 = inlined_call_operand.vmem [shape: f32[1,32], index: 5, kind: input, shape index: {}]   ;;  %s2193_s6 = inlined_call_operand.vmem [shape: f32[32,32], index: 6, kind: input, shape index: {}]   ;;  %s2194_s7 = inlined_call_operand.vmem [shape: f32[1,32], index: 7, kind: input, shape index: {}]   ;;  %s2195_s8 = inlined_call_operand.vmem [shape: f32[1,32], index: 8, kind: input, shape index: {}]   ;;  %s2196_s9 = inlined_call_operand.hbm [shape: f32[2,16], index: 9, kind: output, shape index: {0}]   ;;  %s2197_s10 = inlined_call_operand.vmem [shape: f32[2,46,2], index: 10, kind: output, shape index: {1}, may-alias: {2,10}]  }
   0x1   :  { %v1274_v0 = vld [vmem:[%s2189_s2 + $0x10] sm:$0xff]  ;;  %v1279_v1 = vld [vmem:[%s2189_s2 + $0x18] sm:$0xff]  ;;  %s1200_s19 = smov 2   ;;  %vm155_vm4 = vcmask 1043456   ;;  %vm109_vm5 = vcmask 1045504  }
   0x2   :  { %v182_v2 = vrot.slane %v1274_v0, 5  ;;  %v325_v3 = vrot.slane %v1279_v1, 5  ;;  %v136_v4 = vrot.slane %v1274_v0, 3  ;;  %v293_v5 = vrot.slane %v1279_v1, 3 }
   0x3   :  { %v90_v6 = vrot.slane %v1274_v0, 1  ;;  %v261_v7 = vrot.slane %v1279_v1, 1  ;;  %v205_v11 = vrot.slane %v1274_v0, 6  ;;  %v341_v12 = vrot.slane %v1279_v1, 6 }
   0x4   :  { %v1292_v8 = vsel %vm178_vm0, %v182_v2, %v325_v3  ;;  %v1297_v9 = vsel %vm132_vm1, %v136_v4, %v293_v5  ;;  %v159_v13 = vrot.slane %v1274_v0, 4  ;;  %v309_v14 = vrot.slane %v1279_v1, 4 }
   0x5   :  { %518 = vrot.lane.b32.xlu2 %v1292_v8, %s1198_s17  ;;  %486 = vrot.lane.b32.xlu1 %v1297_v9, %s1199_s18  ;;  %v1306_v10 = vsel %vm2204_vm2, %v90_v6, %v261_v7  ;;  %v113_v15 = vrot.slane %v1274_v0, 2  ;;  %v277_v16 = vrot.slane %v1279_v1, 2  ;;  %v1321_v17 = vsel %vm201_vm3, %v205_v11, %v341_v12 }
   0x6   :  { %454 = vrot.lane.b32.xlu0 %v1306_v10, %s1200_s19  ;;  %v1326_v18 = vsel %vm155_vm4, %v159_v13, %v309_v14 }
   0x7   :  { %16 = vsyncpa [#allocation3], 0  ;;  %v1331_v19 = vsel %vm109_vm5, %v113_v15, %v277_v16  ;;  %v1336_v20 = vld [vmem:[%s2189_s2 + $0x20] sm:$0xff]  ;;  %s1201_s22 = smov 12   ;;  %s1202_s23 = smov 8   ;;  %v228_v22 = vrot.slane %v1274_v0, 7 }
   0x8   :  { %s1203_s24 = smov 4   ;;  %v450_v21 = vrot.slane %v1336_v20, 1  ;;  %v357_v23 = vrot.slane %v1279_v1, 7  ;;  %vm2206_vm6 = vcmask 1040384   ;;  %s1204_s25 = smov 16   ;;  %v466_v26 = vrot.slane %v1336_v20, 2 }
   0x9   :  { %s1205_s26 = smov 14   ;;  %v1369_v28 = vld [vmem:[%s2189_s2 + $0x40] sm:$0xff]  ;;  %v1374_v29 = vld [vmem:[%s2189_s2 + $0x48] sm:$0xff]  ;;  %s1206_s11 = smov 20   ;;  %v482_v30 = vrot.slane %v1336_v20, 3  ;;  %v498_v35 = vrot.slane %v1336_v20, 4 }
   0xa   :  { %v451_v24 = vsel %vm2204_vm2, %v261_v7, %v450_v21  ;;  %v1355_v25 = vsel %vm2206_vm6, %v228_v22, %v357_v23  ;;  %v467_v27 = vsel %vm109_vm5, %v277_v16, %v466_v26  ;;  %s1207_s12 = smov 18   ;;  %v95_v31 = vrot.slane %v1369_v28, 1  ;;  %s1208_s13 = smov 22   ;;  %v1402_v38 = vld [vmem:[%s2189_s2 + $0x28] sm:$0x3f] }
   0xb   :  { %v263_v32 = vrot.slane %v1374_v29, 1  ;;  %v483_v33 = vsel %vm132_vm1, %v293_v5, %v482_v30  ;;  %vm2205_vm7 = vcmask 15360   ;;  %vm1067_vm8 = vcmask 13312   ;;  %s1210_s28 = smov 24   ;;  %s1211_s16 = smov 26  }
   0xc   :  { %v118_v36 = vrot.slane %v1369_v28, 2  ;;  %v279_v37 = vrot.slane %v1374_v29, 2  ;;  %v1209_v39 = vmov 0.0   ;;  %v499_v40 = vsel %vm155_vm4, %v309_v14, %v498_v35  ;;  %s1212_s20 = smov 28   ;;  %s1213_s14 = smov 30  }
   0xd   :  { %534 = vrot.lane.b32.xlu2 %v1321_v17, %s1201_s22  ;;  %502 = vrot.lane.b32.xlu1 %v1326_v18, %s1202_s23  ;;  %v1390_v34 = vsel %vm2204_vm2, %v95_v31, %v263_v32  ;;  %1066 = vst.msk [vmem:[%s2197_s10 + $0x20] sm:$0xff] %vm2205_vm7, %v1209_v39  ;;  %v514_v42 = vrot.slane %v1336_v20, 5  ;;  %v141_v44 = vrot.slane %v1369_v28, 3  ;;  %v295_v45 = vrot.slane %v1374_v29, 3  ;;  %s1214_s15 = smov 32  }
   0xe   :  { %470 = vrot.lane.b32.xlu0 %v1331_v19, %s1203_s24  ;;  %1068 = vst.msk [vmem:[%s2197_s10 + $0x28] sm:$0x3f] %vm1067_vm8, %v1209_v39  ;;  %v1420_v41 = vsel %vm109_vm5, %v118_v36, %v279_v37  ;;  %v530_v48 = vrot.slane %v1336_v20, 6  ;;  %v164_v49 = vrot.slane %v1369_v28, 4  ;;  %v311_v50 = vrot.slane %v1374_v29, 4 }
   0xf   :  { %v515_v46 = vsel %vm178_vm0, %v325_v3, %v514_v42  ;;  %v1447_v47 = vsel %vm132_vm1, %v141_v44, %v295_v45  ;;  %v210_v53 = vrot.slane %v1369_v28, 6  ;;  %v343_v54 = vrot.slane %v1374_v29, 6 }
  0x10   :  { %v531_v51 = vsel %vm201_vm3, %v341_v12, %v530_v48  ;;  %v1464_v52 = vsel %vm155_vm4, %v164_v49, %v311_v50  ;;  %v546_v55 = vrot.slane %v1336_v20, 7  ;;  %v187_v56 = vrot.slane %v1369_v28, 5 }
  0x11   :  { %v327_v57 = vrot.slane %v1374_v29, 5  ;;  %v1480_v58 = vsel %vm201_vm3, %v210_v53, %v343_v54  ;;  %v576_v61 = vrot.slane %v1402_v38, 1  ;;  %v233_v62 = vrot.slane %v1369_v28, 7 }
  0x12   :  { %v547_v59 = vsel %vm2206_vm6, %v357_v23, %v546_v55  ;;  %v359_v63 = vrot.slane %v1374_v29, 7  ;;  %v592_v12 = vrot.slane %v1402_v38, 2  ;;  %v608_v23 = vrot.slane %v1402_v38, 3 }
  0x13   :  { %v1488_v60 = vsel %vm178_vm0, %v187_v56, %v327_v57  ;;  %v577_v3 = vsel %vm2204_vm2, %v450_v21, %v576_v61  ;;  %v656_v61 = vrot.slane %v1402_v38, 6  ;;  %vm378_vm9 = vcmask 31744  }
  0x14   :  { %v1506_v5 = vsel %vm2206_vm6, %v233_v62, %v359_v63  ;;  %v593_v16 = vsel %vm109_vm5, %v466_v26, %v592_v12  ;;  %vm383_vm10 = vcmask 48128   ;;  %vm388_vm11 = vcmask 64512  }
  0x15   :  { %456 = vrot.lane.b32.xlu2 %v451_v24, %s1200_s19  ;;  %562 = vrot.lane.b32.xlu1 %v1279_v1, %s1204_s25  ;;  %v1430_v43 = vld [vmem:[%s2189_s2 + $0x50] sm:$0xff]  ;;  %vm2201_vm12 = vcmask 80896   ;;  %vm2200_vm13 = vcmask 97280   ;;  %vm2199_vm14 = vcmask 113664   ;;  %vm2198_vm15 = vcmask 130048  }
  0x16   :  { %550 = vrot.lane.b32.xlu0 %v1355_v25, %s1205_s26  ;;  %1073 = vst.msk [vmem:[%s2197_s10 + $0x50] sm:$0xff] %vm2205_vm7, %v1209_v39  ;;  %v452_v7 = vrot.slane %v1430_v43, 1  ;;  %v468_v21 = vrot.slane %v1430_v43, 2  ;;  %v484_v26 = vrot.slane %v1430_v43, 3 }
  0x18   :  { %v453_v14 = vsel %vm2204_vm2, %v263_v32, %v452_v7  ;;  %v624_v32 = vrot.slane %v1402_v38, 4 }
  0x1d   :  { %596 = vrot.lane.b32.xlu2 %v467_v27, %s1206_s11  ;;  %472 = vrot.lane.b32.xlu1 %v467_v27, %s1203_s24  ;;  %v609_v27 = vsel %vm132_vm1, %v482_v30, %v608_v23  ;;  %v1549_v30 = vld [vmem:[%s2189_s2 + $0x58] sm:$0x3f] }
  0x1e   :  { %580 = vrot.lane.b32.xlu0 %v451_v24, %s1207_s12  ;;  %v469_v24 = vsel %vm109_vm5, %v279_v37, %v468_v21  ;;  %v625_v37 = vsel %vm155_vm4, %v498_v35, %v624_v32  ;;  %1074 = vst.msk [vmem:[%s2197_s10 + $0x58] sm:$0x3f] %vm1067_vm8, %v1209_v39  ;;  %v640_v35 = vrot.slane %v1402_v38, 5  ;;  %vm413_vm8 = vcmask 146432  }
  0x20   :  { %v641_v55 = vsel %vm178_vm0, %v514_v42, %v640_v35 }
  0x25   :  { %612 = vrot.lane.b32.xlu2 %v483_v33, %s1208_s13  ;;  %488 = vrot.lane.b32.xlu1 %v483_v33, %s1199_s18  ;;  %v1579_v42 = vld [vmem:[%s2189_s2] sm:$0xff] }
  0x26   :  { %458 = vrot.lane.b32.xlu0 %v1390_v34, %s1200_s19  ;;  %1062 = vst.msk [vmem:[%s2197_s10] sm:$0xff] %vm2205_vm7, %v1209_v39 }
  0x2d   :  { %628 = vrot.lane.b32.xlu2 %v499_v40, %s1210_s28  ;;  %504 = vrot.lane.b32.xlu1 %v499_v40, %s1202_s23  ;;  %v485_v40 = vsel %vm132_vm1, %v295_v45, %v484_v26  ;;  %v500_v45 = vrot.slane %v1430_v43, 4 }
  0x2e   :  { %474 = vrot.lane.b32.xlu0 %v1420_v41, %s1203_s24 }
  0x35   :  { %644 = vrot.lane.b32.xlu2 %v515_v46, %s1211_s16  ;;  %520 = vrot.lane.b32.xlu1 %v515_v46, %s1198_s17 }
  0x36   :  { %490 = vrot.lane.b32.xlu0 %v1447_v47, %s1199_s18 }
  0x3d   :  { %660 = vrot.lane.b32.xlu2 %v531_v51, %s1212_s20  ;;  %536 = vrot.lane.b32.xlu1 %v531_v51, %s1201_s22  ;;  %v501_v51 = vsel %vm155_vm4, %v311_v50, %v500_v45  ;;  %v657_v50 = vsel %vm201_vm3, %v530_v48, %v656_v61 }
  0x3e   :  { %506 = vrot.lane.b32.xlu0 %v1464_v52, %s1202_s23 }
  0x45   :  { %538 = vrot.lane.b32.xlu2 %v1480_v58, %s1201_s22  ;;  %552 = vrot.lane.b32.xlu1 %v547_v59, %s1205_s26  ;;  %v516_v59 = vrot.slane %v1430_v43, 5 }
  0x46   :  { %522 = vrot.lane.b32.xlu0 %v1488_v60, %s1198_s17 }
  0x47   :  { %v517_v12 = vsel %vm178_vm0, %v327_v57, %v516_v59 }
  0x4d   :  { %582 = vrot.lane.b32.xlu2 %v577_v3, %s1207_s12  ;;  %554 = vrot.lane.b32.xlu1 %v1506_v5, %s1205_s26 }
  0x4e   :  { %564 = vrot.lane.b32.xlu0 %v1336_v20, %s1204_s25  ;;  %v532_v20 = vrot.slane %v1430_v43, 6 }
  0x55   :  { %460 = vrot.lane.b32.xlu2 %v453_v14, %s1200_s19  ;;  %598 = vrot.lane.b32.xlu1 %v593_v16, %s1206_s11  ;;  %v578_v16 = vrot.slane %v1549_v30, 1 }
  0x56   :  { %566 = vrot.lane.b32.xlu0 %v1374_v29, %s1204_s25 }
  0x57   :  { %v579_v35 = vsel %vm2204_vm2, %v452_v7, %v578_v16  ;;  %v626_v7 = vrot.slane %v1549_v30, 4 }
  0x59   :  { %v627_v16 = vsel %vm155_vm4, %v500_v45, %v626_v7  ;;  %v87_v45 = vrot.slane %v1579_v42, 1 }
  0x5d   :  { %476 = vrot.lane.b32.xlu2 %v469_v24, %s1203_s24  ;;  %614 = vrot.lane.b32.xlu1 %v609_v27, %s1208_s13  ;;  %v548_v27 = vrot.slane %v1430_v43, 7 }
  0x5e   :  { %584 = vrot.lane.b32.xlu0 %v453_v14, %s1207_s12  ;;  %v533_v14 = vsel %vm201_vm3, %v343_v54, %v532_v20 }
  0x5f   :  { %v519_v33 = vpop.permute.xlu2 %518 }
  0x65   :  { %492 = vrot.lane.b32.xlu2 %v485_v40, %s1199_s18  ;;  %630 = vrot.lane.b32.xlu1 %v625_v37, %s1210_s28 }
  0x66   :  { %600 = vrot.lane.b32.xlu0 %v469_v24, %s1206_s11 }
  0x67   :  { %v535_v46 = vpop.permute.xlu2 %534 }
  0x6d   :  { %508 = vrot.lane.b32.xlu2 %v501_v51, %s1202_s23  ;;  %646 = vrot.lane.b32.xlu1 %v641_v55, %s1211_s16  ;;  %v549_v55 = vsel %vm2206_vm6, %v359_v63, %v548_v27  ;;  %v594_v63 = vrot.slane %v1549_v30, 2 }
  0x6e   :  { %616 = vrot.lane.b32.xlu0 %v485_v40, %s1208_s13 }
  0x6f   :  { %v457_v3 = vpop.permute.xlu2 %456  ;;  %v595_v27 = vsel %vm109_vm5, %v468_v21, %v594_v63 }
  0x70   :  { %v673_v21 = vsel %vm2205_vm7, %v1279_v1, %v457_v3  ;;  %v1651_v3 = vld [vmem:[%s2189_s2 + $0x30] sm:$0xff] }
  0x75   :  { %524 = vrot.lane.b32.xlu2 %v517_v12, %s1198_s17  ;;  %662 = vrot.lane.b32.xlu1 %v657_v50, %s1212_s20  ;;  %v610_v50 = vrot.slane %v1549_v30, 3 }
  0x76   :  { %632 = vrot.lane.b32.xlu0 %v501_v51, %s1210_s28 }
  0x77   :  { %v597_v38 = vpop.permute.xlu2 %596  ;;  %v487_v48 = vpop.permute.xlu1 %486 }
  0x78   :  { %v455_v57 = vpop.permute.xlu0 %454 }
  0x79   :  { %v672_v32 = vsel %vm2205_vm7, %v1274_v0, %v455_v57 }
  0x7d   :  { %664 = vrot.lane.b32.xlu2 %v533_v14, %s1212_s20  ;;  %540 = vrot.lane.b32.xlu1 %v533_v14, %s1201_s22 }
  0x7e   :  { %648 = vrot.lane.b32.xlu0 %v517_v12, %s1211_s16 }
  0x7f   :  { %v613_v23 = vpop.permute.xlu2 %612  ;;  %v503_v24 = vpop.permute.xlu1 %502 }
  0x80   :  { %v471_v40 = vpop.permute.xlu0 %470 }
  0x81   :  { %v676_v54 = vsel %vm378_vm9, %v672_v32, %v471_v40  ;;  %v1630_v32 = vld [vmem:[%s2189_s2 + $0x8] sm:$0xff] }
  0x82   :  { %v680_v37 = vsel %vm383_vm10, %v676_v54, %v487_v48  ;;  %v88_v40 = vrot.slane %v1630_v32, 1  ;;  %1069 = vst.msk [vmem:[%s2197_s10 + $0x30] sm:$0xff] %vm2205_vm7, %v1209_v39 }
  0x83   :  { %v684_v51 = vsel %vm388_vm11, %v680_v37, %v503_v24 }
  0x84   :  { %v688_v61 = vsel %vm2201_vm12, %v684_v51, %v519_v33  ;;  %v89_v1 = vsel %vm2204_vm2, %v87_v45, %v88_v40  ;;  %vm433_vm12 = vcmask 211968   ;;  %v202_v45 = vrot.slane %v1579_v42, 6 }
  0x85   :  { %586 = vrot.lane.b32.xlu2 %v579_v35, %s1207_s12  ;;  %568 = vrot.lane.b32.xlu1 %v1430_v43, %s1204_s25  ;;  %v692_v12 = vsel %vm2200_vm13, %v688_v61, %v535_v46  ;;  %v611_v46 = vsel %vm132_vm1, %v484_v26, %v610_v50  ;;  %v658_v26 = vrot.slane %v1549_v30, 6  ;;  %v642_v35 = vrot.slane %v1549_v30, 5 }
  0x86   :  { %556 = vrot.lane.b32.xlu0 %v549_v55, %s1205_s26  ;;  %vm428_vm13 = vcmask 195584   ;;  %v133_v43 = vrot.slane %v1579_v42, 3 }
  0x87   :  { %v629_v48 = vpop.permute.xlu2 %628  ;;  %v563_v57 = vpop.permute.xlu1 %562  ;;  %v659_v7 = vsel %vm201_vm3, %v532_v20, %v658_v26  ;;  %v643_v50 = vsel %vm178_vm0, %v516_v59, %v642_v35  ;;  %v134_v59 = vrot.slane %v1630_v32, 3 }
  0x88   :  { %v551_v33 = vpop.permute.xlu0 %550 }
  0x89   :  { %v696_v14 = vsel %vm2199_vm14, %v692_v12, %v551_v33  ;;  %vm423_vm14 = vcmask 179200   ;;  %v111_v33 = vrot.slane %v1630_v32, 2 }
  0x8a   :  { %v700_v24 = vsel %vm2198_vm15, %v696_v14, %v563_v57  ;;  %vm2202_vm15 = vcmask 162816   ;;  %v157_v57 = vrot.slane %v1630_v32, 4 }
  0x8d   :  { %634 = vrot.lane.b32.xlu2 %v627_v16, %s1210_s28  ;;  %618 = vrot.lane.b32.xlu1 %v611_v46, %s1208_s13 }
  0x8e   :  { %602 = vrot.lane.b32.xlu0 %v595_v27, %s1206_s11 }
  0x8f   :  { %v645_v54 = vpop.permute.xlu2 %644  ;;  %v473_v37 = vpop.permute.xlu1 %472 }
  0x90   :  { %v677_v51 = vsel %vm378_vm9, %v673_v21, %v473_v37  ;;  %v581_v55 = vpop.permute.xlu0 %580  ;;  %v203_v21 = vrot.slane %v1630_v32, 6  ;;  %v226_v37 = vrot.slane %v1630_v32, 7 }
  0x91   :  { %v704_v61 = vsel %vm413_vm8, %v700_v24, %v581_v55  ;;  %v135_v24 = vsel %vm132_vm1, %v133_v43, %v134_v59  ;;  %v179_v55 = vrot.slane %v1579_v42, 5 }
  0x92   :  { %v708_v12 = vsel %vm2202_vm15, %v704_v61, %v597_v38  ;;  %vm2203_vm15 = vcmask 228352   ;;  %v180_v61 = vrot.slane %v1630_v32, 5 }
  0x93   :  { %v712_v30 = vsel %vm423_vm14, %v708_v12, %v613_v23  ;;  %v156_v23 = vrot.slane %v1579_v42, 4 }
  0x94   :  { %v716_v20 = vsel %vm428_vm13, %v712_v30, %v629_v48  ;;  %v110_v48 = vrot.slane %v1579_v42, 2 }
  0x95   :  { %666 = vrot.lane.b32.xlu1 %v659_v7, %s1212_s20  ;;  %97 = vrot.lane.b32.xlu2 %v89_v1, %s1200_s19  ;;  %v720_v38 = vsel %vm433_vm12, %v716_v20, %v645_v54  ;;  %v158_v27 = vsel %vm155_vm4, %v156_v23, %v157_v57  ;;  %v225_v54 = vrot.slane %v1579_v42, 7 }
  0x96   :  { %650 = vrot.lane.b32.xlu0 %v643_v50, %s1211_s16  ;;  %v112_v26 = vsel %vm109_vm5, %v110_v48, %v111_v33  ;;  %v204_v50 = vsel %vm201_vm3, %v202_v45, %v203_v21 }
  0x97   :  { %v661_v39 = vpop.permute.xlu2 %660  ;;  %v489_v63 = vpop.permute.xlu1 %488  ;;  %v227_v20 = vsel %vm2206_vm6, %v225_v54, %v226_v37 }
  0x98   :  { %v681_v14 = vsel %vm383_vm10, %v677_v51, %v489_v63  ;;  %v459_v16 = vpop.permute.xlu0 %458  ;;  %v1675_v46 = vsel %vm2203_vm15, %v720_v38, %v661_v39  ;;  %v181_v38 = vsel %vm178_vm0, %v179_v55, %v180_v61  ;;  %vm2207_vm15 = vcmask 80896  }
  0x99   :  { %v674_v12 = vsel %vm2205_vm7, %v1369_v28, %v459_v16  ;;  %v1719_v16 = vld [vmem:[%s2189_s2 + $0x38] sm:$0xff] }
  0x9d   :  { %143 = vrot.lane.b32.xlu1 %v135_v24, %s1199_s18  ;;  %166 = vrot.lane.b32.xlu2 %v158_v27, %s1202_s23  ;;  %v92_v24 = vrot.slane %v1651_v3, 1  ;;  %v93_v27 = vrot.slane %v1719_v16, 1 }
  0x9e   :  { %120 = vrot.lane.b32.xlu0 %v112_v26, %s1203_s24 }
  0x9f   :  { %v539_v35 = vpop.permute.xlu2 %538  ;;  %v505_v51 = vpop.permute.xlu1 %504  ;;  %v94_v55 = vsel %vm2204_vm2, %v92_v24, %v93_v27 }
  0xa0   :  { %v685_v7 = vsel %vm388_vm11, %v681_v14, %v505_v51  ;;  %v475_v1 = vpop.permute.xlu0 %474  ;;  %v91_v14 = vsel %vm2204_vm2, %v88_v40, %v90_v6  ;;  %v114_v51 = vsel %vm109_vm5, %v111_v33, %v113_v15  ;;  %vm2210_vm2 = vcmask 80896  }
  0xa1   :  { %v678_v30 = vsel %vm378_vm9, %v674_v12, %v475_v1  ;;  %v116_v1 = vrot.slane %v1719_v16, 2 }
  0xa5   :  { %212 = vrot.lane.b32.xlu1 %v204_v50, %s1201_s22  ;;  %235 = vrot.lane.b32.xlu2 %v227_v20, %s1205_s26 }
  0xa6   :  { %189 = vrot.lane.b32.xlu0 %v181_v38, %s1198_s17 }
  0xa7   :  { %v583_v43 = vpop.permute.xlu2 %582  ;;  %v521_v23 = vpop.permute.xlu1 %520 }
  0xa8   :  { %v689_v39 = vsel %vm2207_vm15, %v685_v7, %v521_v23  ;;  %v491_v63 = vpop.permute.xlu0 %490  ;;  %vm2208_vm15 = vcmask 97280   ;;  %v115_v7 = vrot.slane %v1651_v3, 2 }
  0xa9   :  { %v682_v48 = vsel %vm383_vm10, %v678_v30, %v491_v63  ;;  %v138_v63 = vrot.slane %v1651_v3, 3 }
  0xaa   :  { %v117_v23 = vsel %vm109_vm5, %v115_v7, %v116_v1 }
  0xad   :  { %99 = vrot.lane.b32.xlu1 %v91_v14, %s1200_s19  ;;  %265 = vrot.lane.b32.xlu2 %v91_v14, %s1207_s12 }
  0xae   :  { %247 = vrot.lane.b32.xlu0 %v1630_v32, %s1204_s25 }
  0xaf   :  { %v461_v26 = vpop.permute.xlu2 %460  ;;  %v537_v45 = vpop.permute.xlu1 %536 }
  0xb0   :  { %v693_v6 = vsel %vm2208_vm15, %v689_v39, %v537_v45  ;;  %v507_v40 = vpop.permute.xlu0 %506  ;;  %v675_v12 = vsel %vm2205_vm7, %v1374_v29, %v461_v26  ;;  %vm2209_vm15 = vcmask 113664   ;;  %v137_v29 = vsel %vm132_vm1, %v134_v59, %v136_v4 }
  0xb1   :  { %v686_v54 = vsel %vm388_vm11, %v682_v48, %v507_v40  ;;  %vm2211_vm7 = vcmask 97280   ;;  %v139_v48 = vrot.slane %v1719_v16, 3 }
  0xb5   :  { %281 = vrot.lane.b32.xlu1 %v114_v51, %s1206_s11  ;;  %101 = vrot.lane.b32.xlu2 %v94_v55, %s1200_s19 }
  0xb6   :  { %122 = vrot.lane.b32.xlu0 %v114_v51, %s1203_s24  ;;  %v162_v51 = vrot.slane %v1719_v16, 4 }
  0xb7   :  { %v477_v30 = vpop.permute.xlu2 %476  ;;  %v553_v50 = vpop.permute.xlu1 %552 }
  0xb8   :  { %v679_v15 = vsel %vm378_vm9, %v675_v12, %v477_v30  ;;  %v697_v33 = vsel %vm2209_vm15, %v693_v6, %v553_v50  ;;  %v523_v20 = vpop.permute.xlu0 %522  ;;  %v140_v6 = vsel %vm132_vm1, %v138_v63, %v139_v48 }
  0xb9   :  { %v690_v38 = vsel %vm2210_vm2, %v686_v54, %v523_v20  ;;  %vm2212_vm2 = vmmov %vm2209_vm15  ;;  %vm2213_vm15 = vcmask 130048   ;;  %v161_v54 = vrot.slane %v1651_v3, 4 }
  0xba   :  { %v694_v39 = vsel %vm2211_vm7, %v690_v38, %v539_v35  ;;  %v160_v35 = vsel %vm155_vm4, %v157_v57, %v159_v13  ;;  %vm2214_vm7 = vcmask 162816  }
  0xbb   :  { %v163_v50 = vsel %vm155_vm4, %v161_v54, %v162_v51 }
  0xbd   :  { %297 = vrot.lane.b32.xlu1 %v137_v29, %s1208_s13  ;;  %124 = vrot.lane.b32.xlu2 %v117_v23, %s1203_s24 }
  0xbe   :  { %145 = vrot.lane.b32.xlu0 %v137_v29, %s1199_s18 }
  0xbf   :  { %v493_v14 = vpop.permute.xlu2 %492  ;;  %v555_v24 = vpop.permute.xlu1 %554 }
  0xc0   :  { %v683_v4 = vsel %vm383_vm10, %v679_v15, %v493_v14  ;;  %v698_v59 = vsel %vm2212_vm2, %v694_v39, %v555_v24  ;;  %v565_v26 = vpop.permute.xlu0 %564  ;;  %vm2215_vm2 = vmmov %vm2213_vm15  ;;  %v184_v15 = vrot.slane %v1651_v3, 5  ;;  %v206_v39 = vsel %vm201_vm3, %v203_v21, %v205_v11 }
  0xc1   :  { %v701_v45 = vsel %vm2213_vm15, %v697_v33, %v565_v26  ;;  %v185_v33 = vrot.slane %v1719_v16, 5  ;;  %vm2216_vm15 = vcmask 80896   ;;  %v207_v14 = vrot.slane %v1651_v3, 6 }
  0xc2   :  { %v705_v40 = vsel %vm413_vm8, %v701_v45, %v583_v43  ;;  %v183_v43 = vsel %vm178_vm0, %v180_v61, %v182_v2  ;;  %v208_v24 = vrot.slane %v1719_v16, 6  ;;  %v229_v45 = vsel %vm2206_vm6, %v226_v37, %v228_v22 }
  0xc3   :  { %v186_v63 = vsel %vm178_vm0, %v184_v15, %v185_v33 }
  0xc5   :  { %313 = vrot.lane.b32.xlu1 %v160_v35, %s1210_s28  ;;  %147 = vrot.lane.b32.xlu2 %v140_v6, %s1199_s18  ;;  %v230_v6 = vrot.slane %v1651_v3, 7 }
  0xc6   :  { %168 = vrot.lane.b32.xlu0 %v160_v35, %s1202_s23  ;;  %v209_v35 = vsel %vm201_vm3, %v207_v14, %v208_v24 }
  0xc7   :  { %v509_v55 = vpop.permute.xlu2 %508  ;;  %v599_v12 = vpop.permute.xlu1 %598 }
  0xc8   :  { %v687_v13 = vsel %vm388_vm11, %v683_v4, %v509_v55  ;;  %v709_v57 = vsel %vm2214_vm7, %v705_v40, %v599_v12  ;;  %v567_v7 = vpop.permute.xlu0 %566  ;;  %v231_v40 = vrot.slane %v1719_v16, 7 }
  0xc9   :  { %v702_v30 = vsel %vm2215_vm2, %v698_v59, %v567_v7  ;;  %vm2217_vm2 = vcmask 97280  }
  0xca   :  { %v232_v37 = vsel %vm2206_vm6, %v230_v6, %v231_v40  ;;  %vm2221_vm6 = vcmask 130048  }
  0xcd   :  { %329 = vrot.lane.b32.xlu1 %v183_v43, %s1211_s16  ;;  %170 = vrot.lane.b32.xlu2 %v163_v50, %s1202_s23 }
  0xce   :  { %191 = vrot.lane.b32.xlu0 %v183_v43, %s1198_s17 }
  0xcf   :  { %v525_v20 = vpop.permute.xlu2 %524  ;;  %v615_v38 = vpop.permute.xlu1 %614 }
  0xd0   :  { %v691_v29 = vsel %vm2216_vm15, %v687_v13, %v525_v20  ;;  %v713_v2 = vsel %vm423_vm14, %v709_v57, %v615_v38  ;;  %v585_v61 = vpop.permute.xlu0 %584  ;;  %vm2218_vm15 = vcmask 1046528  }
  0xd1   :  { %v706_v23 = vsel %vm413_vm8, %v702_v30, %v585_v61  ;;  %v96_v20 = vsel %vm2218_vm15, %v93_v27, %v95_v31  ;;  %v119_v31 = vsel %vm109_vm5, %v116_v1, %v118_v36  ;;  %vm2222_vm15 = vcmask 162816  }
  0xd2   :  { %v142_v36 = vsel %vm132_vm1, %v139_v48, %v141_v44  ;;  %v165_v44 = vsel %vm155_vm4, %v162_v51, %v164_v49  ;;  %vm2223_vm1 = vcmask 15360   ;;  %v188_v49 = vsel %vm178_vm0, %v185_v33, %v187_v56 }
  0xd3   :  { %vm2224_vm4 = vmmov %vm2223_vm1  ;;  %vm2226_vm0 = vcmask 97280  }
  0xd5   :  { %345 = vrot.lane.b32.xlu1 %v206_v39, %s1212_s20  ;;  %193 = vrot.lane.b32.xlu2 %v186_v63, %s1198_s17 }
  0xd6   :  { %214 = vrot.lane.b32.xlu0 %v206_v39, %s1201_s22 }
  0xd7   :  { %v665_v4 = vpop.permute.xlu2 %664  ;;  %v631_v59 = vpop.permute.xlu1 %630 }
  0xd8   :  { %v1809_v26 = vsel %vm428_vm13, %v713_v2, %v631_v59  ;;  %v601_v11 = vpop.permute.xlu0 %600 }
  0xd9   :  { %v710_v21 = vsel %vm2214_vm7, %v706_v23, %v601_v11  ;;  %vm2219_vm7 = vcmask 228352  }
  0xdd   :  { %361 = vrot.lane.b32.xlu1 %v229_v45, %s1213_s14  ;;  %216 = vrot.lane.b32.xlu2 %v209_v35, %s1201_s22 }
  0xde   :  { %237 = vrot.lane.b32.xlu0 %v229_v45, %s1205_s26 }
  0xdf   :  { %v587_v54 = vpop.permute.xlu2 %586  ;;  %v1825_v55 = vpop.permute.xlu1 %646 }
  0xe0   :  { %v617_v12 = vpop.permute.xlu0 %616 }
  0xe1   :  { %v714_v22 = vsel %vm423_vm14, %v710_v21, %v617_v12 }
  0xe5   :  { %732 = vrot.lane.b32.xlu1 %v1675_v46, %s1214_s15  ;;  %239 = vrot.lane.b32.xlu2 %v232_v37, %s1205_s26 }
  0xe6   :  { %249 = vrot.lane.b32.xlu0 %v1274_v0, %s1204_s25 }
  0xe7   :  { %v635_v13 = vpop.permute.xlu2 %634  ;;  %v1836_v57 = vpop.permute.xlu1 %662 }
  0xe8   :  { %v633_v7 = vpop.permute.xlu0 %632 }
  0xe9   :  { %v718_v30 = vsel %vm428_vm13, %v714_v22, %v633_v7 }
  0xed   :  { %251 = vrot.lane.b32.xlu1 %v1719_v16, %s1204_s25  ;;  %283 = vrot.lane.b32.xlu2 %v1331_v19, %s1206_s11 }
  0xee   :  { %267 = vrot.lane.b32.xlu0 %v1306_v10, %s1207_s12 }
  0xef   :  { %v541_v46 = vpop.permute.xlu1 %540  ;;  %v98_v43 = vpop.permute.xlu2 %97 }
  0xf0   :  { %v695_v50 = vsel %vm2217_vm2, %v691_v29, %v541_v46  ;;  %v649_v0 = vpop.permute.xlu0 %648  ;;  %vm2220_vm2 = vcmask 113664   ;;  %v374_v11 = vsel %vm2223_vm1, %v1579_v42, %v98_v43 }
  0xf1   :  { %v722_v15 = vsel %vm433_vm12, %v718_v30, %v649_v0 }
  0xf2   :  { %v1853_v38 = vsel %vm2219_vm7, %v722_v15, %v665_v4  ;;  %vm2227_vm7 = vmmov %vm2220_vm2 }
  0xf5   :  { %269 = vrot.lane.b32.xlu1 %v96_v20, %s1207_s12  ;;  %299 = vrot.lane.b32.xlu2 %v1297_v9, %s1208_s13 }
  0xf6   :  { %103 = vrot.lane.b32.xlu0 %v96_v20, %s1200_s19 }
  0xf7   :  { %v569_v10 = vpop.permute.xlu1 %568  ;;  %v167_v19 = vpop.permute.xlu2 %166 }
  0xf8   :  { %v557_v29 = vpop.permute.xlu0 %556 }
  0xf9   :  { %v699_v2 = vsel %vm2220_vm2, %v695_v50, %v557_v29  ;;  %vm2228_vm2 = vcmask 228352   ;;  %v752_v29 = vld [vmem:[%s2190_s3 + $0x20] sm:$0xff] }
  0xfa   :  { %v703_v61 = vsel %vm2221_vm6, %v699_v2, %v569_v10  ;;  %vm2225_vm6 = vcmask 80896  }
  0xfb   :  { %v707_v27 = vsel %vm413_vm8, %v703_v61, %v587_v54 }
  0xfd   :  { %285 = vrot.lane.b32.xlu1 %v119_v31, %s1206_s11  ;;  %315 = vrot.lane.b32.xlu2 %v1326_v18, %s1210_s28 }
  0xfe   :  { %126 = vrot.lane.b32.xlu0 %v119_v31, %s1203_s24 }
  0xff   :  { %v619_v9 = vpop.permute.xlu1 %618  ;;  %v236_v23 = vpop.permute.xlu2 %235 }
 0x100   :  { %v603_v39 = vpop.permute.xlu0 %602 }
 0x101   :  { %v711_v63 = vsel %vm2222_vm15, %v707_v27, %v603_v39  ;;  %vm2230_vm15 = vcmask 1040384  }
 0x102   :  { %v715_v14 = vsel %vm423_vm14, %v711_v63, %v619_v9 }
 0x103   :  { %v1879_v1 = vsel %vm428_vm13, %v715_v14, %v635_v13 }
 0x105   :  { %301 = vrot.lane.b32.xlu1 %v142_v36, %s1208_s13  ;;  %331 = vrot.lane.b32.xlu2 %v1292_v8, %s1211_s16 }
 0x106   :  { %149 = vrot.lane.b32.xlu0 %v142_v36, %s1199_s18 }
 0x107   :  { %v1885_v18 = vpop.permute.xlu1 %666  ;;  %v266_v4 = vpop.permute.xlu2 %265 }
 0x108   :  { %v1887_v59 = vpop.permute.xlu0 %650 }
 0x10d   :  { %317 = vrot.lane.b32.xlu1 %v165_v44, %s1210_s28  ;;  %347 = vrot.lane.b32.xlu2 %v1321_v17, %s1212_s20 }
 0x10e   :  { %172 = vrot.lane.b32.xlu0 %v165_v44, %s1202_s23 }
 0x10f   :  { %v144_v8 = vpop.permute.xlu1 %143  ;;  %v102_v48 = vpop.permute.xlu2 %101 }
 0x110   :  { %v121_v21 = vpop.permute.xlu0 %120  ;;  %v376_v51 = vsel %vm2224_vm4, %v1651_v3, %v102_v48  ;;  %v211_v3 = vsel %vm201_vm3, %v208_v24, %v210_v53  ;;  %vm2229_vm3 = vcmask 130048   ;;  %vm2232_vm4 = vmmov %vm2226_vm0 }
 0x111   :  { %v379_v45 = vsel %vm378_vm9, %v374_v11, %v121_v21 }
 0x112   :  { %v384_v35 = vsel %vm383_vm10, %v379_v45, %v144_v8 }
 0x113   :  { %v389_v17 = vsel %vm388_vm11, %v384_v35, %v167_v19 }
 0x115   :  { %333 = vrot.lane.b32.xlu1 %v188_v49, %s1211_s16  ;;  %363 = vrot.lane.b32.xlu2 %v1355_v25, %s1213_s14  ;;  %v721_v25 = vsel %vm433_vm12, %v1809_v26, %v1825_v55  ;;  %v234_v26 = vsel %vm2230_vm15, %v231_v40, %v233_v62  ;;  %v755_v40 = vld [vmem:[%s2190_s3 + $0x38] sm:$0x3f] }
 0x116   :  { %195 = vrot.lane.b32.xlu0 %v188_v49, %s1198_s17  ;;  %v725_v37 = vsel %vm2228_vm2, %v721_v25, %v1836_v57  ;;  %1096 = vmatpush.msk.msra.mxu1 %vm109_vm5, %v755_v40 }
 0x117   :  { %v213_v42 = vpop.permute.xlu1 %212  ;;  %v125_v6 = vpop.permute.xlu2 %124  ;;  %1105 = vmatpush.msk.msra.mxu3 %vm109_vm5, %v755_v40  ;;  %vm2231_vm5 = vmmov %vm2225_vm6 }
 0x118   :  { %v190_v54 = vpop.permute.xlu0 %189  ;;  %v381_v12 = vsel %vm378_vm9, %v376_v51, %v125_v6 }
 0x119   :  { %v394_v22 = vsel %vm2225_vm6, %v389_v17, %v190_v54  ;;  %vm2233_vm6 = vmmov %vm2228_vm2  ;;  %vm443_vm2 = vcmask 244736  }
 0x11a   :  { %v399_v56 = vsel %vm2226_vm0, %v394_v22, %v213_v42  ;;  %vm2234_vm0 = vmmov %vm2227_vm7 }
 0x11b   :  { %v404_v33 = vsel %vm2227_vm7, %v399_v56, %v236_v23  ;;  %vm2235_vm7 = vcmask 162816   ;;  %vm2236_vm15 = vmmov %vm2233_vm6 }
 0x11d   :  { %349 = vrot.lane.b32.xlu1 %v211_v3, %s1212_s20  ;;  %734 = vrot.lane.b32.xlu2 %v725_v37, %s1214_s15 }
 0x11e   :  { %218 = vrot.lane.b32.xlu0 %v211_v3, %s1201_s22 }
 0x11f   :  { %v100_v13 = vpop.permute.xlu1 %99  ;;  %v148_v7 = vpop.permute.xlu2 %147 }
 0x120   :  { %v248_v30 = vpop.permute.xlu0 %247  ;;  %v386_v53 = vsel %vm383_vm10, %v381_v12, %v148_v7  ;;  %v375_v43 = vsel %vm2223_vm1, %v1630_v32, %v100_v13  ;;  %v753_v32 = vld [vmem:[%s2190_s3 + $0x28] sm:$0xff]  ;;  %vm756_vm1 = vcmask 506880  }
 0x121   :  { %v409_v24 = vsel %vm2229_vm3, %v404_v33, %v248_v30  ;;  %vm44_vm3 = vcmask 261120  }
 0x122   :  { %v1939_v55 = vsel %vm413_vm8, %v409_v24, %v266_v4 }
 0x125   :  { %365 = vrot.lane.b32.xlu1 %v234_v26, %s1213_s14  ;;  %253 = vrot.lane.b32.xlu2 %v1369_v28, %s1204_s25  ;;  %v754_v28 = vld [vmem:[%s2190_s3 + $0x30] sm:$0xff] }
 0x126   :  { %241 = vrot.lane.b32.xlu0 %v234_v26, %s1205_s26  ;;  %781 = vmatpush.msra.mxu1 %v754_v28 }
 0x127   :  { %v282_v57 = vpop.permute.xlu1 %281  ;;  %v171_v46 = vpop.permute.xlu2 %170  ;;  %1106 = vmatpush.msra.mxu3 %v754_v28 }
 0x128   :  { %v123_v50 = vpop.permute.xlu0 %122  ;;  %v391_v0 = vsel %vm388_vm11, %v386_v53, %v171_v46  ;;  %782 = vmatpush.msra.mxu1 %v753_v32  ;;  %v419_v44 = vsel %vm2235_vm7, %v1939_v55, %v282_v57 }
 0x129   :  { %v1949_v62 = vsel %vm378_vm9, %v375_v43, %v123_v50  ;;  %1107 = vmatpush.msra.mxu3 %v753_v32 }
 0x12a   :  { %783 = vmatpush.msra.mxu1 %v752_v29 }
 0x12b   :  { %1108 = vmatpush.msra.mxu3 %v752_v29 }
 0x12d   :  { %271 = vrot.lane.b32.xlu1 %v1390_v34, %s1207_s12  ;;  %287 = vrot.lane.b32.xlu2 %v1420_v41, %s1206_s11  ;;  %v751_v34 = vld [vmem:[%s2190_s3 + $0x18] sm:$0xff]  ;;  %v750_v41 = vld [vmem:[%s2190_s3 + $0x10] sm:$0xff] }
 0x12e   :  { %736 = vrot.lane.b32.xlu0 %v1853_v38, %s1214_s15  ;;  %784 = vmatpush.msra.mxu1 %v751_v34  ;;  %v749_v38 = vld [vmem:[%s2190_s3 + $0x8] sm:$0xff] }
 0x12f   :  { %v298_v15 = vpop.permute.xlu1 %297  ;;  %v194_v20 = vpop.permute.xlu2 %193  ;;  %1109 = vmatpush.msra.mxu3 %v751_v34  ;;  %v39_v34 = vld [vmem:[%s2193_s6 + $0x18] sm:$0xff] }
 0x130   :  { %v146_v10 = vpop.permute.xlu0 %145  ;;  %v396_v19 = vsel %vm2231_vm5, %v391_v0, %v194_v20  ;;  %785 = vmatpush.msra.mxu1 %v750_v41  ;;  %60 = vmatpush.msra.mxu0 %v39_v34 }
 0x131   :  { %1110 = vmatpush.msra.mxu3 %v750_v41  ;;  %v385_v6 = vsel %vm383_vm10, %v1949_v62, %v146_v10  ;;  %v38_v41 = vld [vmem:[%s2193_s6 + $0x10] sm:$0xff] }
 0x132   :  { %786 = vmatpush.msra.mxu1 %v749_v38  ;;  %61 = vmatpush.msra.mxu0 %v38_v41 }
 0x133   :  { %1111 = vmatpush.msra.mxu3 %v749_v38  ;;  %v804_v38 = vld [vmem:[%s2191_s4 + $0x18] sm:$0xff] }
 0x134   :  { %1113 = vmatpush.msra.mxu2 %v804_v38 }
 0x135   :  { %335 = vrot.lane.b32.xlu2 %v1488_v60, %s1211_s16  ;;  %319 = vrot.lane.b32.xlu1 %v1464_v52, %s1210_s28  ;;  %v748_v60 = vld [vmem:[%s2190_s3] sm:$0xff]  ;;  %v723_v52 = vsel %vm433_vm12, %v1879_v1, %v1887_v59 }
 0x136   :  { %303 = vrot.lane.b32.xlu0 %v1447_v47, %s1208_s13  ;;  %787 = vmatpush.msra.mxu1 %v748_v60  ;;  %v727_v47 = vsel %vm2233_vm6, %v723_v52, %v1885_v18  ;;  %vm2237_vm6 = vmmov %vm2234_vm0 }
 0x137   :  { %v314_v2 = vpop.permute.xlu1 %313  ;;  %v217_v61 = vpop.permute.xlu2 %216  ;;  %1112 = vmatpush.msra.mxu3 %v748_v60  ;;  %v36_v60 = vld [vmem:[%s2193_s6] sm:$0xff] }
 0x138   :  { %v169_v31 = vpop.permute.xlu0 %168  ;;  %v401_v27 = vsel %vm2232_vm4, %v396_v19, %v217_v61 }
 0x139   :  { %v390_v54 = vsel %vm388_vm11, %v385_v6, %v169_v31  ;;  %v803_v31 = vld [vmem:[%s2191_s4 + $0x10] sm:$0xff] }
 0x13a   :  { %1114 = vmatpush.msra.mxu2 %v803_v31 }
 0x13d   :  { %738 = vrot.lane.b32.xlu2 %v727_v47, %s1214_s15  ;;  %367 = vrot.lane.b32.xlu1 %v1506_v5, %s1213_s14  ;;  %v424_v5 = vsel %vm423_vm14, %v419_v44, %v298_v15  ;;  %v35_v47 = vld [vmem:[%s2188_s1] sm:$0x3]  ;;  %s1215_s1 = smov [#allocation2]  }
 0x13e   :  { %351 = vrot.lane.b32.xlu0 %v1480_v58, %s1212_s20  ;;  %v429_v8 = vsel %vm428_vm13, %v424_v5, %v314_v2  ;;  %v37_v2 = vld [vmem:[%s2193_s6 + $0x8] sm:$0xff]  ;;  %s1080_s6 = sshll.u32 %s1215_s1, 4  ;;  %s1081_s6 = int_to_ptr.vmem [resolvable:$true] %s1080_s6 }
 0x13f   :  { %v330_v9 = vpop.permute.xlu1 %329  ;;  %v240_v23 = vpop.permute.xlu2 %239  ;;  %62 = vmatpush.msra.mxu0 %v37_v2 }
 0x140   :  { %v192_v39 = vpop.permute.xlu0 %191  ;;  %v2002_v63 = vsel %vm2234_vm0, %v401_v27, %v240_v23  ;;  %v434_v58 = vsel %vm433_vm12, %v429_v8, %v330_v9  ;;  %vm2238_vm0 = vcmask 130048   ;;  %v802_v9 = vld [vmem:[%s2191_s4 + $0x8] sm:$0xff] }
 0x141   :  { %v395_v12 = vsel %vm2231_vm5, %v390_v54, %v192_v39  ;;  %vm2239_vm5 = vmmov %vm2238_vm0  ;;  %1115 = vmatpush.msra.mxu2 %v802_v9  ;;  %63 = vmatpush.msra.mxu0 %v36_v60 }
 0x142   :  { %1095 = vmatmul.msk.f32.vlgmr.msra.gmra.mxu0 %vm44_vm3, %v35_v47  ;;  %v854_v47 = vld [vmem:[%s2187_s0 + $0x10] sm:$0xff] }
 0x143   :  { %833 = vmatpush.msrb.mxu0 %v804_v38 }
 0x145   :  { %834 = vmatpush.msrb.mxu0 %v803_v31 }
 0x147   :  { %v346_v14 = vpop.permute.xlu1 %345  ;;  %v284_v36 = vpop.permute.xlu2 %283  ;;  %835 = vmatpush.msrb.mxu0 %v802_v9 }
 0x148   :  { %v215_v1 = vpop.permute.xlu0 %214  ;;  %v439_v48 = vsel %vm2236_vm15, %v434_v58, %v346_v14 }
 0x149   :  { %v400_v22 = vsel %vm2232_vm4, %v395_v12, %v215_v1  ;;  %vm2240_vm4 = vmmov %vm2235_vm7 }
 0x14f   :  { %v362_v4 = vpop.permute.xlu1 %361  ;;  %v300_v59 = vpop.permute.xlu2 %299 }
 0x150   :  { %v238_v18 = vpop.permute.xlu0 %237  ;;  %v444_v11 = vsel %vm443_vm2, %v439_v48, %v362_v4 }
 0x151   :  { %v405_v56 = vsel %vm2237_vm6, %v400_v22, %v238_v18  ;;  %vm2241_vm6 = vcmask 15360  }
 0x157   :  { %v733_v21 = vpop.permute.xlu1 %732  ;;  %v316_v45 = vpop.permute.xlu2 %315 }
 0x158   :  { %v250_v35 = vpop.permute.xlu0 %249  ;;  %v744_v49 = vsel %vm44_vm3, %v444_v11, %v733_v21 }
 0x159   :  { %1097 = vmatmul.msk.f32.vlgmr.msra.gmra.mxu1 %vm756_vm1, %v744_v49  ;;  %v410_v33 = vsel %vm2238_vm0, %v405_v56, %v250_v35  ;;  %vm2242_vm0 = vmmov %vm2236_vm15 }
 0x15f   :  { %v252_v17 = vpop.permute.xlu1 %251  ;;  %v332_v51 = vpop.permute.xlu2 %331 }
 0x160   :  { %v268_v42 = vpop.permute.xlu0 %267  ;;  %v411_v52 = vsel %vm2239_vm5, %v2002_v63, %v252_v17 }
 0x161   :  { %v415_v13 = vsel %vm413_vm8, %v410_v33, %v268_v42 }
 0x162   :  { %v420_v7 = vsel %vm2235_vm7, %v415_v13, %v284_v36  ;;  %vm2243_vm7 = vcmask 80896  }
 0x163   :  { %v425_v30 = vsel %vm423_vm14, %v420_v7, %v300_v59  ;;  %v801_v7 = vld [vmem:[%s2191_s4] sm:$0xff]  ;;  %s1082_s4 = sshll.u32 %s2196_s9, 4  ;;  %s1083_s4 = int_to_ptr.hbm [resolvable:$true] %s1082_s4 }
 0x164   :  { %v430_v55 = vsel %vm428_vm13, %v425_v30, %v316_v45  ;;  %836 = vmatpush.msrb.mxu0 %v801_v7  ;;  %1116 = vmatpush.msra.mxu2 %v801_v7 }
 0x165   :  { %v435_v57 = vsel %vm433_vm12, %v430_v55, %v332_v51  ;;  %v1135_v55 = vld [vmem:[%s2194_s7] ss:$0 sm:$0xff] }
 0x167   :  { %v270_v3 = vpop.permute.xlu1 %269  ;;  %v348_v25 = vpop.permute.xlu2 %347 }
 0x168   :  { %v104_v37 = vpop.permute.xlu0 %103  ;;  %v440_v46 = vsel %vm2236_vm15, %v435_v57, %v348_v25  ;;  %v416_v23 = vsel %vm413_vm8, %v411_v52, %v270_v3  ;;  %vm2246_vm15 = vmmov %vm2239_vm5 }
 0x169   :  { %v377_v14 = vsel %vm2241_vm6, %v1719_v16, %v104_v37  ;;  %vm2248_vm5 = vmmov %vm2242_vm0 }
 0x16f   :  { %v286_v53 = vpop.permute.xlu1 %285  ;;  %v364_v24 = vpop.permute.xlu2 %363 }
 0x170   :  { %v127_v26 = vpop.permute.xlu0 %126  ;;  %v445_v43 = vsel %vm443_vm2, %v440_v46, %v364_v24  ;;  %v421_v39 = vsel %vm2240_vm4, %v416_v23, %v286_v53 }
 0x171   :  { %v382_v36 = vsel %vm378_vm9, %v377_v14, %v127_v26  ;;  %vm2244_vm9 = vcmask 97280  }
 0x177   :  { %v302_v50 = vpop.permute.xlu1 %301  ;;  %v735_v0 = vpop.permute.xlu2 %734 }
 0x178   :  { %v150_v62 = vpop.permute.xlu0 %149  ;;  %v745_v40 = vsel %vm44_vm3, %v445_v43, %v735_v0  ;;  %v426_v63 = vsel %vm423_vm14, %v421_v39, %v302_v50  ;;  %v852_v50 = vld [vmem:[%s2187_s0] sm:$0xff] }
 0x179   :  { %1098 = vmatmul.msk.f32.gmra.mxu1 %vm756_vm1, %v745_v40  ;;  %v387_v4 = vsel %vm383_vm10, %v382_v36, %v150_v62  ;;  %vm2245_vm10 = vcmask 113664   ;;  %v1136_v0 = vld [vmem:[%s2192_s5] ss:$0 sm:$0xff] }
 0x17f   :  { %v318_v28 = vpop.permute.xlu1 %317  ;;  %v254_v29 = vpop.permute.xlu2 %253 }
 0x180   :  { %v173_v32 = vpop.permute.xlu0 %172  ;;  %v431_v1 = vsel %vm428_vm13, %v426_v63, %v318_v28 }
 0x181   :  { %v392_v44 = vsel %vm388_vm11, %v387_v4, %v173_v32  ;;  %vm2247_vm11 = vmmov %vm2240_vm4  ;;  %v855_v4 = vld [vmem:[%s2187_s0 + $0x18] sm:$0xff] }
 0x187   :  { %v334_v15 = vpop.permute.xlu1 %333  ;;  %v288_v18 = vpop.permute.xlu2 %287 }
 0x188   :  { %v196_v20 = vpop.permute.xlu0 %195  ;;  %v436_v59 = vsel %vm433_vm12, %v431_v1, %v334_v15  ;;  %v1137_v15 = vld [vmem:[%s2195_s8] ss:$0 sm:$0xff] }
 0x189   :  { %v397_v16 = vsel %vm2243_vm7, %v392_v44, %v196_v20 }
 0x18f   :  { %v350_v10 = vpop.permute.xlu1 %349  ;;  %v336_v51 = vpop.permute.xlu2 %335 }
 0x190   :  { %v219_v19 = vpop.permute.xlu0 %218  ;;  %v441_v5 = vsel %vm2242_vm0, %v436_v59, %v350_v10 }
 0x191   :  { %v402_v11 = vsel %vm2244_vm9, %v397_v16, %v219_v19 }
 0x197   :  { %v366_v61 = vpop.permute.xlu1 %365  ;;  %v739_v33 = vpop.permute.xlu2 %738 }
 0x198   :  { %v242_v27 = vpop.permute.xlu0 %241  ;;  %v446_v58 = vsel %vm443_vm2, %v441_v5, %v366_v61 }
 0x199   :  { %v407_v45 = vsel %vm2245_vm10, %v402_v11, %v242_v27  ;;  %vm1023_vm10 = vcmask 130112  }
 0x19a   :  { %v412_v35 = vsel %vm2246_vm15, %v407_v45, %v254_v29  ;;  %v853_v29 = vld [vmem:[%s2187_s0 + $0x8] sm:$0xff]  ;;  %vm1051_vm15 = vcmask 7168  }
 0x19f   :  { %v272_v8 = vpop.permute.xlu1 %271 }
 0x1a0   :  { %v737_v48 = vpop.permute.xlu0 %736  ;;  %v417_v49 = vsel %vm413_vm8, %v412_v35, %v272_v8 }
 0x1a1   :  { %v746_v21 = vsel %vm44_vm3, %v446_v58, %v737_v48  ;;  %v422_v6 = vsel %vm2247_vm11, %v417_v49, %v288_v18  ;;  %vm2249_vm11 = vcmask 1046528  }
 0x1a2   :  { %1099 = vmatmul.msk.f32.vlgmr.msra.gmra.mxu3 %vm756_vm1, %v746_v21 }
 0x1a7   :  { %v320_v17 = vpop.permute.xlu1 %319 }
 0x1a8   :  { %v304_v42 = vpop.permute.xlu0 %303 }
 0x1a9   :  { %v427_v54 = vsel %vm423_vm14, %v422_v6, %v304_v42 }
 0x1aa   :  { %v432_v12 = vsel %vm428_vm13, %v427_v54, %v320_v17 }
 0x1ab   :  { %v437_v3 = vsel %vm433_vm12, %v432_v12, %v336_v51 }
 0x1af   :  { %v368_v22 = vpop.permute.xlu1 %367 }
 0x1b0   :  { %v352_v56 = vpop.permute.xlu0 %351 }
 0x1b1   :  { %v442_v25 = vsel %vm2248_vm5, %v437_v3, %v352_v56  ;;  %vm2250_vm5 = vmmov %vm2249_vm11 }
 0x1b2   :  { %v447_v37 = vsel %vm443_vm2, %v442_v25, %v368_v22 }
 0x1b3   :  { %v747_v13 = vsel %vm44_vm3, %v447_v37, %v739_v33 }
 0x1b4   :  { %1100 = vmatmul.msk.f32.gmra.mxu3 %vm756_vm1, %v747_v13 }
 0x1bf   :  { %v65_v57 = vpop.f32.mrf.mxu0 }
 0x1c0   :  { %v66_v46 = vadd.f32 %v1135_v55, %v65_v57 }
 0x1c2   :  { %v856_v43 = vperm.slane %v66_v46, 0  ;;  %v851_v60 = vrot.slane %v66_v46, 1 }
 0x1c4   :  { %v860_v62 = vadd.f32 %v856_v43, %v852_v50  ;;  %v861_v34 = vadd.f32 %v856_v43, %v853_v29  ;;  %v857_v52 = vperm.slane %v851_v60, 0 }
 0x1c6   :  { %v862_v9 = vadd.f32 %v857_v52, %v854_v47  ;;  %v863_v44 = vadd.f32 %v857_v52, %v855_v4 }
 0x1d6   :  { %v789_v30 = vpop.f32.mrf.mxu1 }
 0x1d7   :  { %1101 = vmatmul.msk.f32.vlgmr.msrb.gmra.mxu0 %vm44_vm3, %v789_v30 }
 0x1f6   :  { %v792_v53 = vpop.f32.mrf.mxu1 }
 0x1f7   :  { %1102 = vmatmul.msk.f32.vlgmr.msra.gmra.mxu2 %vm44_vm3, %v792_v53 }
 0x225   :  { %v795_v24 = vpop.f32.mrf.mxu3 }
 0x226   :  { %1103 = vmatmul.msk.f32.gmra.mxu2 %vm44_vm3, %v795_v24 }
 0x237   :  { %v798_v26 = vpop.f32.mrf.mxu3 }
 0x238   :  { %1104 = vmatmul.msk.f32.gmra.mxu2 %vm44_vm3, %v798_v26 }
 0x254   :  { %v838_v40 = vpop.f32.mrf.mxu0 }
 0x255   :  { %v839_v28 = vadd.f32 %v1136_v0, %v838_v40 }
 0x257   :  { %v864_v32 = vadd.f32 %v860_v62, %v839_v28 }
 0x259   :  { %1138 = vtanh.f32 %v864_v32 }
 0x25f   :  { %v1139_v20 = vpop.eup %1138 }
 0x260   :  { %v876_v10 = vmul.f32 %v1139_v20, %v1137_v15 }
 0x262   :  { %v880_v19 = vsel %vm44_vm3, %v876_v10, 0.0 }
 0x263   :  { %881 = vadd.xlane.f32.xlu0 %v880_v19 }
 0x27a   :  { %v841_v41 = vpop.f32.mrf.mxu2 }
 0x27b   :  { %v842_v38 = vadd.f32 %v1136_v0, %v841_v41 }
 0x27d   :  { %v865_v2 = vadd.f32 %v861_v34, %v842_v38 }
 0x27f   :  { %1140 = vtanh.f32 %v865_v2  ;;  %v1018_v2 = vlaneseq }
 0x281   :  { %v2115_v52 = vand.u32 127, %v1018_v2 }
 0x285   :  { %v1141_v61 = vpop.eup %1140 }
 0x286   :  { %v877_v31 = vmul.f32 %v1141_v61, %v1137_v15 }
 0x288   :  { %v883_v27 = vsel %vm44_vm3, %v877_v31, 0.0 }
 0x289   :  { %884 = vadd.xlane.f32.xlu1 %v883_v27 }
 0x2a9   :  { %v844_v23 = vpop.f32.mrf.mxu2 }
 0x2aa   :  { %v845_v39 = vadd.f32 %v1136_v0, %v844_v23 }
 0x2ac   :  { %v866_v14 = vadd.f32 %v862_v9, %v845_v39 }
 0x2ae   :  { %1142 = vtanh.f32 %v866_v14  ;;  %v2118_v14 = vadd.s32 4294967288, %v2115_v52 }
 0x2b4   :  { %v1143_v63 = vpop.eup %1142 }
 0x2b5   :  { %v878_v36 = vmul.f32 %v1143_v63, %v1137_v15 }
 0x2b7   :  { %v886_v1 = vsel %vm44_vm3, %v878_v36, 0.0 }
 0x2b8   :  { %887 = vadd.xlane.f32.xlu2 %v886_v1 }
 0x2bb   :  { %v847_v59 = vpop.f32.mrf.mxu2 }
 0x2bc   :  { %v848_v18 = vadd.f32 %v1136_v0, %v847_v59 }
 0x2be   :  { %v867_v5 = vadd.f32 %v863_v44, %v848_v18 }
 0x2c0   :  { %1144 = vtanh.f32 %v867_v5 }
 0x2c6   :  { %v1145_v8 = vpop.eup %1144 }
 0x2c7   :  { %v879_v16 = vmul.f32 %v1145_v8, %v1137_v15 }
 0x2c9   :  { %v889_v58 = vsel %vm44_vm3, %v879_v16, 0.0 }
 0x2ca   :  { %890 = vadd.xlane.f32.xlu2 %v889_v58 }
 0x2d6   :  { %v882_v48 = vpop.xlane.xlu0 %881 }
 0x2d7   :  { %v892_v11 = vsub.f32 0.0, %v882_v48 }
 0x2d9   :  { %v896_v21 = vmul.f32 1.442695, %v892_v11  ;;  %v1166_v11 = vld [vmem:[%s2189_s2 + $0x8] sm:$0xff] }
 0x2db   :  { %1146 = vpow2.f32 %v896_v21 }
 0x2e1   :  { %v1147_v45 = vpop.eup %1146 }
 0x2e2   :  { %v904_v35 = vadd.f32 1.0, %v1147_v45  ;;  %v1167_v45 = vld [vmem:[%s2189_s2 + $0x18] sm:$0xff] }
 0x2e4   :  { %1148 = vrcp.f32 %v904_v35  ;;  %vm913_vm13 = vweird.f32 %v904_v35  ;;  %v919_v13 = vand.u32 2147483648, %v904_v35  ;;  %v917_v30 = vand.u32 2147483647, %v904_v35 }
 0x2e6   :  { %v920_v57 = vor.u32 1.1754944e-38, %v919_v13  ;;  %vm918_vm1 = vcmp.eq.f32.partialorder %v917_v30, 8.507059e+37 }
 0x2ea   :  { %v1149_v42 = vpop.eup %1148 }
 0x2eb   :  { %v909_v54 = vmul.f32 %v1149_v42, %v904_v35  ;;  %vm914_vm12 = vweird.f32 %v1149_v42 }
 0x2ec   :  { %vm915_vm8 = vmor %vm913_vm13, %vm914_vm12  ;;  %vm2252_vm13 = vcmask 15360  }
 0x2ed   :  { %v910_v22 = vsub.f32 1.0, %v909_v54  ;;  %vm2251_vm12 = vmmov %vm2250_vm5 }
 0x2ef   :  { %v911_v56 = vmul.f32 %v1149_v42, %v910_v22 }
 0x2f1   :  { %v912_v33 = vadd.f32 %v1149_v42, %v911_v56 }
 0x2f3   :  { %v916_v55 = vsel %vm915_vm8, %v1149_v42, %v912_v33  ;;  %vm2254_vm8 = vmmov %vm2252_vm13 }
 0x2f4   :  { %v921_v50 = vsel %vm918_vm1, %v920_v57, %v916_v55 }
 0x2fc   :  { %v885_v49 = vpop.xlane.xlu1 %884 }
 0x2fd   :  { %v893_v17 = vsub.f32 0.0, %v885_v49 }
 0x2ff   :  { %v898_v51 = vmul.f32 1.442695, %v893_v17  ;;  %v1168_v17 = vld [vmem:[%s2189_s2 + $0x10] sm:$0xff] }
 0x301   :  { %1150 = vpow2.f32 %v898_v51 }
 0x307   :  { %v1151_v6 = vpop.eup %1150 }
 0x308   :  { %v905_v12 = vadd.f32 1.0, %v1151_v6 }
 0x30a   :  { %1152 = vrcp.f32 %v905_v12  ;;  %v934_v7 = vand.u32 2147483648, %v905_v12  ;;  %v932_v24 = vand.u32 2147483647, %v905_v12  ;;  %vm928_vm2 = vweird.f32 %v905_v12 }
 0x30c   :  { %v935_v46 = vor.u32 1.1754944e-38, %v934_v7  ;;  %vm933_vm4 = vcmp.eq.f32.partialorder %v932_v24, 8.507059e+37 }
 0x310   :  { %v1153_v3 = vpop.eup %1152 }
 0x311   :  { %v924_v25 = vmul.f32 %v1153_v3, %v905_v12  ;;  %vm929_vm14 = vweird.f32 %v1153_v3 }
 0x312   :  { %vm930_vm3 = vmor %vm928_vm2, %vm929_vm14 }
 0x313   :  { %v925_v37 = vsub.f32 1.0, %v924_v25  ;;  %vm2253_vm14 = vmmov %vm2252_vm13 }
 0x315   :  { %v926_v53 = vmul.f32 %v1153_v3, %v925_v37 }
 0x317   :  { %v927_v26 = vadd.f32 %v1153_v3, %v926_v53 }
 0x319   :  { %v931_v43 = vsel %vm930_vm3, %v1153_v3, %v927_v26 }
 0x31a   :  { %v936_v0 = vsel %vm933_vm4, %v935_v46, %v931_v43 }
 0x31b   :  { %v968_v62 = vadd.f32 %v936_v0, %v921_v50 }
 0x31d   :  { %v969_v40 = vrot.slane %v968_v62, 4 }
 0x31f   :  { %v970_v28 = vadd.f32 %v969_v40, %v968_v62 }
 0x321   :  { %v971_v32 = vrot.slane %v970_v28, 2 }
 0x323   :  { %v972_v15 = vadd.f32 %v971_v32, %v970_v28 }
 0x325   :  { %v973_v20 = vrot.slane %v972_v15, 1 }
 0x327   :  { %v974_v10 = vadd.f32 %v973_v20, %v972_v15 }
 0x329   :  { %1154 = vrcp.f32 %v974_v10  ;;  %v993_v27 = vand.u32 2147483648, %v974_v10  ;;  %v991_v60 = vand.u32 2147483647, %v974_v10  ;;  %vm987_vm0 = vweird.f32 %v974_v10 }
 0x32b   :  { %v888_v19 = vpop.xlane.xlu2 %887  ;;  %v994_v39 = vor.u32 1.1754944e-38, %v993_v27  ;;  %vm992_vm9 = vcmp.eq.f32.partialorder %v991_v60, 8.507059e+37 }
 0x32c   :  { %v894_v29 = vsub.f32 0.0, %v888_v19 }
 0x32e   :  { %v900_v34 = vmul.f32 1.442695, %v894_v29 }
 0x32f   :  { %v1155_v41 = vpop.eup %1154 }
 0x330   :  { %v983_v38 = vmul.f32 %v1155_v41, %v974_v10  ;;  %1156 = vpow2.f32 %v900_v34  ;;  %vm988_vm6 = vweird.f32 %v1155_v41 }
 0x331   :  { %vm989_vm7 = vmor %vm987_vm0, %vm988_vm6 }
 0x332   :  { %v984_v61 = vsub.f32 1.0, %v983_v38 }
 0x334   :  { %v985_v31 = vmul.f32 %v1155_v41, %v984_v61 }
 0x336   :  { %v986_v47 = vadd.f32 %v1155_v41, %v985_v31  ;;  %v1157_v9 = vpop.eup %1156 }
 0x337   :  { %v906_v63 = vadd.f32 1.0, %v1157_v9 }
 0x338   :  { %v990_v23 = vsel %vm989_vm7, %v1155_v41, %v986_v47 }
 0x339   :  { %v995_v36 = vsel %vm992_vm9, %v994_v39, %v990_v23  ;;  %1158 = vrcp.f32 %v906_v63  ;;  %vm943_vm3 = vweird.f32 %v906_v63  ;;  %v949_v26 = vand.u32 2147483648, %v906_v63 }
 0x33a   :  { %v1010_v1 = vmul.f32 %v995_v36, %v921_v50  ;;  %v1011_v4 = vmul.f32 %v995_v36, %v936_v0  ;;  %v947_v57 = vand.u32 2147483647, %v906_v63 }
 0x33b   :  { %v950_v62 = vor.u32 1.1754944e-38, %v949_v26 }
 0x33c   :  { %v1020_v18 = vperm.slane %v1010_v1, %v2115_v52  ;;  %v1022_v44 = vperm.slane %v1011_v4, %v2118_v14  ;;  %v1033_v5 = vrot.slane %v1010_v1, 1  ;;  %v1034_v8 = vrot.slane %v1011_v4, 1 }
 0x33d   :  { %v891_v59 = vpop.xlane.xlu2 %890  ;;  %vm948_vm7 = vcmp.eq.f32.partialorder %v947_v57, 8.507059e+37 }
 0x33e   :  { %v895_v16 = vsub.f32 0.0, %v891_v59  ;;  %v2123_v58 = vsel %vm1023_vm10, %v1022_v44, %v1020_v18  ;;  %v1035_v48 = vsel %vm2249_vm11, %v1033_v5, %v1034_v8  ;;  %v1045_v21 = vadd.f32 %v1166_v11, %v1033_v5 }
 0x33f   :  { %v1047_v35 = vadd.f32 %v1167_v45, %v1034_v8  ;;  %v1046_v51 = vadd.f32 %v1168_v17, %v1035_v48  ;;  %v1159_v56 = vpop.eup %1158 }
 0x340   :  { %v902_v49 = vmul.f32 1.442695, %v895_v16  ;;  %v1052_v42 = vsel %vm1051_vm15, %v1045_v21, %v1033_v5  ;;  %v939_v25 = vmul.f32 %v1159_v56, %v906_v63  ;;  %vm944_vm2 = vweird.f32 %v1159_v56 }
 0x341   :  { %v1054_v6 = vsel %vm1051_vm15, %v1047_v35, %v1034_v8  ;;  %v1053_v54 = vsel %vm1051_vm15, %v1046_v51, %v1035_v48  ;;  %v1058_v12 = vsel %vm2250_vm5, 0.0, %v1052_v42  ;;  %vm945_vm4 = vmor %vm943_vm3, %vm944_vm2  ;;  %vm2255_vm2 = vcmask 1046528  }
 0x342   :  { %1160 = vpow2.f32 %v902_v49  ;;  %v1060_v22 = vsel %vm2251_vm12, %v1054_v6, 0.0  ;;  %1063 = vst.msk [vmem:[%s2197_s10 + $0x8] sm:$0xff] %vm2252_vm13, %v1058_v12  ;;  %v940_v37 = vsub.f32 1.0, %v939_v25  ;;  %vm2257_vm3 = vmmov %vm2255_vm2 }
 0x343   :  { %1064 = vst.msk [vmem:[%s2197_s10 + $0x10] sm:$0xff] %vm2253_vm14, %v1053_v54  ;;  %vm1028_vm14 = vcmask 1041409  }
 0x344   :  { %1065 = vst.msk [vmem:[%s2197_s10 + $0x18] sm:$0xff] %vm2254_vm8, %v1060_v22  ;;  %v941_v13 = vmul.f32 %v1159_v56, %v940_v37  ;;  %vm1031_vm8 = vcmask 123904  }
 0x346   :  { %v942_v53 = vadd.f32 %v1159_v56, %v941_v13 }
 0x348   :  { %v1161_v3 = vpop.eup %1160  ;;  %v946_v0 = vsel %vm945_vm4, %v1159_v56, %v942_v53 }
 0x349   :  { %v907_v33 = vadd.f32 1.0, %v1161_v3  ;;  %v951_v32 = vsel %vm948_vm7, %v950_v62, %v946_v0 }
 0x34b   :  { %1162 = vrcp.f32 %v907_v33  ;;  %v964_v55 = vand.u32 2147483648, %v907_v33  ;;  %v962_v43 = vand.u32 2147483647, %v907_v33  ;;  %vm958_vm6 = vweird.f32 %v907_v33  ;;  %v1169_v16 = vld [vmem:[%s2189_s2 + $0x38] sm:$0xff]  ;;  %v1170_v11 = vld [vmem:[%s2189_s2 + $0x48] sm:$0xff] }
 0x34d   :  { %v965_v40 = vor.u32 1.1754944e-38, %v964_v55  ;;  %vm963_vm9 = vcmp.eq.f32.partialorder %v962_v43, 8.507059e+37 }
 0x351   :  { %v1163_v7 = vpop.eup %1162 }
 0x352   :  { %v954_v30 = vmul.f32 %v1163_v7, %v907_v33  ;;  %vm959_vm1 = vweird.f32 %v1163_v7 }
 0x353   :  { %vm960_vm0 = vmor %vm958_vm6, %vm959_vm1  ;;  %vm2258_vm1 = vcmask 15360  }
 0x354   :  { %v955_v24 = vsub.f32 1.0, %v954_v30  ;;  %vm2259_vm4 = vmmov %vm2258_vm1 }
 0x355   :  { %vm2260_vm6 = vmmov %vm2258_vm1 }
 0x356   :  { %v956_v46 = vmul.f32 %v1163_v7, %v955_v24 }
 0x358   :  { %v957_v50 = vadd.f32 %v1163_v7, %v956_v46 }
 0x35a   :  { %v961_v28 = vsel %vm960_vm0, %v1163_v7, %v957_v50 }
 0x35b   :  { %v966_v15 = vsel %vm963_vm9, %v965_v40, %v961_v28 }
 0x35c   :  { %v975_v20 = vadd.f32 %v966_v15, %v951_v32 }
 0x35e   :  { %v976_v10 = vrot.slane %v975_v20, 4 }
 0x360   :  { %v977_v19 = vadd.f32 %v976_v10, %v975_v20 }
 0x362   :  { %v978_v29 = vrot.slane %v977_v19, 2 }
 0x364   :  { %v979_v34 = vadd.f32 %v978_v29, %v977_v19 }
 0x366   :  { %v980_v41 = vrot.slane %v979_v34, 1 }
 0x368   :  { %v981_v38 = vadd.f32 %v980_v41, %v979_v34 }
 0x36a   :  { %1164 = vrcp.f32 %v981_v38  ;;  %v1007_v27 = vand.u32 2147483648, %v981_v38  ;;  %v1005_v47 = vand.u32 2147483647, %v981_v38  ;;  %vm1001_vm5 = vweird.f32 %v981_v38 }
 0x36c   :  { %v1008_v23 = vor.u32 1.1754944e-38, %v1007_v27  ;;  %vm1006_vm13 = vcmp.eq.f32.partialorder %v1005_v47, 8.507059e+37 }
 0x370   :  { %v1165_v2 = vpop.eup %1164 }
 0x371   :  { %v997_v61 = vmul.f32 %v1165_v2, %v981_v38  ;;  %vm1002_vm11 = vweird.f32 %v1165_v2 }
 0x372   :  { %vm1003_vm12 = vmor %vm1001_vm5, %vm1002_vm11 }
 0x373   :  { %v998_v31 = vsub.f32 1.0, %v997_v61 }
 0x375   :  { %v999_v60 = vmul.f32 %v1165_v2, %v998_v31 }
 0x377   :  { %v1000_v9 = vadd.f32 %v1165_v2, %v999_v60 }
 0x379   :  { %v1004_v39 = vsel %vm1003_vm12, %v1165_v2, %v1000_v9 }
 0x37a   :  { %v1009_v63 = vsel %vm1006_vm13, %v1008_v23, %v1004_v39 }
 0x37b   :  { %v1012_v36 = vmul.f32 %v1009_v63, %v951_v32  ;;  %v1013_v1 = vmul.f32 %v1009_v63, %v966_v15 }
 0x37d   :  { %v1025_v4 = vperm.slane %v1012_v36, %v2115_v52  ;;  %v1026_v59 = vperm.slane %v1013_v1, %v2118_v14  ;;  %v1036_v18 = vrot.slane %v1012_v36, 1  ;;  %v1037_v44 = vrot.slane %v1013_v1, 1  ;;  %v1171_v14 = vld [vmem:[%s2189_s2 + $0x40] sm:$0xff] }
 0x37f   :  { %v1027_v5 = vsel %vm1023_vm10, %v1026_v59, %v1025_v4  ;;  %v1038_v8 = vsel %vm2255_vm2, %v1036_v18, %v1037_v44  ;;  %v1048_v48 = vadd.f32 %v1169_v16, %v1036_v18  ;;  %v1050_v21 = vadd.f32 %v1170_v11, %v1037_v44  ;;  %vm2256_vm10 = vmmov %vm2255_vm2 }
 0x380   :  { %v1029_v52 = vsel %vm1028_vm14, %v1027_v5, %v2123_v58  ;;  %v1049_v45 = vadd.f32 %v1171_v14, %v1038_v8 }
 0x381   :  { %1032 = vst.msk [vmem:[#allocation2] sm:$0x3] %vm1031_vm8, %v1029_v52  ;;  %v1055_v35 = vsel %vm1051_vm15, %v1048_v48, %v1036_v18  ;;  %v1057_v49 = vsel %vm1051_vm15, %v1050_v21, %v1037_v44 }
 0x382   :  { %v1056_v17 = vsel %vm1051_vm15, %v1049_v45, %v1038_v8  ;;  %v1059_v51 = vsel %vm2256_vm10, 0.0, %v1055_v35  ;;  %v1061_v42 = vsel %vm2257_vm3, %v1057_v49, 0.0  ;;  %1085 = dma.vmem_to_hbm [thread:$0]  %s1081_s6, 32, %s1083_s4, [#allocation3]  }
 0x383   :  { %1070 = vst.msk [vmem:[%s2197_s10 + $0x38] sm:$0xff] %vm2258_vm1, %v1059_v51 }
 0x384   :  { %1071 = vst.msk [vmem:[%s2197_s10 + $0x40] sm:$0xff] %vm2259_vm4, %v1056_v17 }
 0x385   :  { %1072 = vst.msk [vmem:[%s2197_s10 + $0x48] sm:$0xff] %vm2260_vm6, %v1061_v42 }
 0x386   :  { %1196 = dma.done.wait [#allocation3], 32  }
 0x387   :  { %1197 = vsyncadd [#allocation3], 4294967264 }
 0x388   :  { %1094 = vsyncpa [#allocation3], 1 }

</bundles_post_ra>
